<compile_context>
chip_gen: v7x
topology: tpu7x:2x2x1
jax: 0.10.0
libtpu: 0.0.40
codegen_flags: <defaults>
</compile_context>

<pallas_src>
import numpy as np
import jax
import jax.numpy as jnp
from jax import lax
from jax.experimental import pallas as pl
from jax.experimental.pallas import tpu as pltpu


def pointer_gen_decoder_kernel(
    # per-batch-block data
    emb_ref,      # (T, BB, D)  f32 target-token embeddings
    preh_ref,     # (BB, S, D)  f32 encoder hidden states
    hid0_ref,     # (BB, D)     f32 initial hidden state
    inp_ref,      # (BB, S)     i32 source token ids
    words_ref,    # (T, BB, 1)  i32 target token ids
    len_ref,      # (BB, 1)     i32 target lengths
    ilen_ref,     # (BB, 1)     i32 source lengths
    # shared weights
    wih4_ref,     # (D, 4D)   fused LSTM input weights  [i|f|g|o]
    whh4_ref,     # (D, 4D)   fused LSTM hidden weights [i|f|g|o]
    blstm_ref,    # (1, 4D)   fused LSTM bias
    wh_t_ref,     # (D, D)    W_h^T
    bs_ref,       # (1, D)    bias of W_s
    v_ref,        # (1, D)    v_t as a row
    cellw_ref,    # (D, 2D+1) [W_s^T | V_cell^T | W_s_t^T]
    ctxw_ref,     # (D, D+1)  [V_ctx^T | W_h_prime^T]
    bv_ref,       # (1, D)    bias of V
    vp_t_ref,     # (D, Vo)   V_prime^T
    bvp_ref,      # (1, Vo)   bias of V_prime
    bpg_ref,      # (1, 1)    bias of W_s_t
    wxt_ref,      # (D, 1)    W_x_t^T
    # output
    out_ref,      # (T-1, BB, 1)
    # VMEM scratch
    pf_ref,       # (BB, S, D) hoisted pre_h @ W_h^T + b_s
    xp_ref,       # (T, BB, 1) hoisted emb @ W_x_t^T
):
    T, BB, D = emb_ref.shape
    S = preh_ref.shape[1]
    Vo = vp_t_ref.shape[1]
    Tm1 = T - 1
    NEG = jnp.float32(-1e30)

    il = ilen_ref[...]                                   # (BB, 1)
    steps = len_ref[...] - 1                             # (BB, 1)
    inp_ids = inp_ref[...]                               # (BB, S)

    src_iota = lax.broadcasted_iota(jnp.int32, (1, S), 1)
    src_valid = src_iota < il                            # (BB, S)
    vocab_iota = lax.broadcasted_iota(jnp.int32, (1, Vo), 1)

    # ---- hoisted, loop-invariant projections (one big MXU matmul each) ----
    pf_ref[...] = (
        jnp.dot(preh_ref[...].reshape(BB * S, D), wh_t_ref[...],
                preferred_element_type=jnp.float32) + bs_ref[...]
    ).reshape(BB, S, D)
    xp_ref[...] = jnp.dot(
        emb_ref[...].reshape(T * BB, D), wxt_ref[...],
        preferred_element_type=jnp.float32).reshape(T, BB, 1)

    v_row = v_ref[...].reshape(1, 1, D)
    b4 = blstm_ref[...]
    bv = bv_ref[...]
    bvp = bvp_ref[...]
    bpg = bpg_ref[...]

    def step(j, carry):
        hid, cell = carry                                # (BB, D) each
        active = j < steps                               # (BB, 1)

        x = emb_ref[j]                                   # (BB, D)
        wj = words_ref[j]                                # (BB, 1)
        wj1 = words_ref[j + 1]                           # (BB, 1)

        # ---- fused LSTM cell (gate order i, f, g, o) ----
        gates = (jnp.dot(x, wih4_ref[...], preferred_element_type=jnp.float32)
                 + jnp.dot(hid, whh4_ref[...], preferred_element_type=jnp.float32)
                 + b4)                                   # (BB, 4D)
        i_g = jax.nn.sigmoid(gates[:, 0:D])
        f_g = jax.nn.sigmoid(gates[:, D:2 * D])
        g_g = jnp.tanh(gates[:, 2 * D:3 * D])
        o_g = jax.nn.sigmoid(gates[:, 3 * D:4 * D])
        cell_new = f_g * cell + i_g * g_g
        hid_new = o_g * jnp.tanh(cell_new)

        # ---- fused cell-side heads: [W_s | V_cell | W_s_t] ----
        cproj = jnp.dot(cell_new, cellw_ref[...],
                        preferred_element_type=jnp.float32)       # (BB, 2D+1)
        cell_att = cproj[:, 0:D]
        cell_voc = cproj[:, D:2 * D]
        cell_pg = cproj[:, 2 * D:2 * D + 1]

        # ---- attention over encoder states (torch attends with the *cell*) ----
        feat = jnp.tanh(pf_ref[...] + cell_att[:, None, :])       # (BB, S, D)
        e = jnp.sum(feat * v_row, axis=2)                         # (BB, S)
        e = jnp.where(src_valid, e, NEG)
        m = jnp.max(e, axis=1, keepdims=True)
        p = jnp.exp(e - m)                 # masked lanes underflow to exactly 0
        a = p / jnp.sum(p, axis=1, keepdims=True)                 # (BB, S)
        context = jnp.sum(a[:, :, None] * preh_ref[...], axis=1)  # (BB, D)

        # ---- fused context-side heads: [V_ctx | W_h_prime] ----
        ctxp = jnp.dot(context, ctxw_ref[...],
                       preferred_element_type=jnp.float32)        # (BB, D+1)
        hidden = ctxp[:, 0:D] + cell_voc + bv                     # (BB, D)

        # ---- vocab distribution ----
        logits = (jnp.dot(hidden, vp_t_ref[...],
                          preferred_element_type=jnp.float32) + bvp)  # (BB, Vo)
        lm = jnp.max(logits, axis=1, keepdims=True)
        lexp = jnp.exp(logits - lm)
        lsum = jnp.sum(lexp, axis=1, keepdims=True)

        # ---- p_gen ----
        xnp = xp_ref[j + 1]                                       # (BB, 1)
        p_gen = jax.nn.sigmoid(ctxp[:, D:D + 1] + cell_pg + bpg + xnp)

        # ---- pointer mass on source tokens equal to words[:, j] ----
        match = jnp.logical_and(inp_ids == wj, src_valid)
        a_idx = jnp.sum(jnp.where(match, a, 0.0), axis=1, keepdims=True)

        # ---- vocab prob of target token words[:, j+1] (reuse lexp/lsum) ----
        p_vocab = jnp.sum(jnp.where(vocab_iota == wj1, lexp, 0.0),
                          axis=1, keepdims=True) / lsum

        final = p_gen * p_vocab + (1.0 - p_gen) * a_idx           # (BB, 1)

        out_ref[j] = jnp.where(active, final, 0.0)
        hid = jnp.where(active, hid_new, hid)
        cell = jnp.where(active, cell_new, cell)
        return hid, cell

    cell0 = jnp.zeros((BB, D), dtype=jnp.float32)
    lax.fori_loop(0, Tm1, step, (hid0_ref[...], cell0))


def pointer_gen_decoder(params, words, lengths, pre_h, inp, input_len,
                        *, batch_block=8):
    """pre_h is batch-major (B, S, D); returns (B, T-1, 1)."""
    B, T = words.shape
    S, D = pre_h.shape[1], pre_h.shape[2]
    Vo = params["vp_t"].shape[1]
    Tm1 = T - 1

    BB = batch_block
    assert BB % 8 == 0, "batch block must be a multiple of 8 (sublane tile)"
    Bp = ((B + BB - 1) // BB) * BB
    pad = Bp - B

    words = words.astype(jnp.int32)
    lengths = lengths.astype(jnp.int32)
    input_len = input_len.astype(jnp.int32)
    inp = inp.astype(jnp.int32)
    pre_h = pre_h.astype(jnp.float32)

    if pad:  # dummy rows: lengths=1 -> 0 decode steps, input_len=1 -> valid mask
        words = jnp.pad(words, ((0, pad), (0, 0)))
        inp = jnp.pad(inp, ((0, pad), (0, 0)))
        pre_h = jnp.pad(pre_h, ((0, pad), (0, 0), (0, 0)))
        lengths = jnp.pad(lengths, (0, pad), constant_values=1)
        input_len = jnp.pad(input_len, (0, pad), constant_values=1)

    # ---- plain-JAX glue: embedding gather, initial hidden, weight packing ----
    emb_t = jnp.transpose(params["embedding"][words], (1, 0, 2))      # (T, Bp, D)
    words_t = jnp.transpose(words)[:, :, None]                        # (T, Bp, 1)
    hid0 = pre_h[jnp.arange(Bp), input_len - 1, :]                    # (Bp, D)

    wih4 = jnp.concatenate([params["wih"][g] for g in range(4)], axis=1)   # (D, 4D)
    whh4 = jnp.concatenate([params["whh"][g] for g in range(4)], axis=1)   # (D, 4D)
    b4 = jnp.concatenate([params["blstm"][g] for g in range(4)], axis=1)   # (1, 4D)
    cellw = jnp.concatenate([params["ws_t"], params["vs"], params["wst"]],
                            axis=1)                                        # (D, 2D+1)
    ctxw = jnp.concatenate([params["vc"], params["whp"]], axis=1)          # (D, D+1)
    v_row = jnp.transpose(params["v"])                                     # (1, D)

    def full(shape):
        zeros = (0,) * len(shape)
        return pl.BlockSpec(shape, lambda i: zeros)

    grid_spec = pltpu.PrefetchScalarGridSpec(
        num_scalar_prefetch=0,
        grid=(Bp // BB,),
        in_specs=[
            pl.BlockSpec((T, BB, D), lambda i: (0, i, 0)),    # emb_t
            pl.BlockSpec((BB, S, D), lambda i: (i, 0, 0)),    # pre_h
            pl.BlockSpec((BB, D), lambda i: (i, 0)),          # hid0
            pl.BlockSpec((BB, S), lambda i: (i, 0)),          # source ids
            pl.BlockSpec((T, BB, 1), lambda i: (0, i, 0)),    # target ids
            pl.BlockSpec((BB, 1), lambda i: (i, 0)),          # lengths
            pl.BlockSpec((BB, 1), lambda i: (i, 0)),          # input_len
            full((D, 4 * D)), full((D, 4 * D)), full((1, 4 * D)),   # LSTM
            full((D, D)), full((1, D)), full((1, D)),               # W_h, b_s, v
            full((D, 2 * D + 1)), full((D, D + 1)), full((1, D)),   # fused heads, b_V
            full((D, Vo)), full((1, Vo)),                           # V_prime
            full((1, 1)), full((D, 1)),                             # b_{W_s_t}, W_x_t
        ],
        out_specs=pl.BlockSpec((Tm1, BB, 1), lambda i: (0, i, 0)),
        scratch_shapes=[
            pltpu.VMEM((BB, S, D), jnp.float32),   # hoisted encoder projection
            pltpu.VMEM((T, BB, 1), jnp.float32),   # hoisted emb @ W_x_t
        ],
    )

    out = pl.pallas_call(
        pointer_gen_decoder_kernel,
        out_shape=jax.ShapeDtypeStruct((Tm1, Bp, 1), jnp.float32),
        grid_spec=grid_spec,
        compiler_params=pltpu.CompilerParams(
            dimension_semantics=("parallel",)),
    )(
        emb_t, pre_h, hid0, inp, words_t,
        lengths[:, None], input_len[:, None],
        wih4, whh4, b4,
        params["wh_t"], params["bs"], v_row,
        cellw, ctxw, params["bv"],
        params["vp_t"], params["bvp"], params["bwst"], params["wxt"],
    )
    return jnp.transpose(out, (1, 0, 2))[:B]   # (B, T-1, 1)


def init_params(key, dict_size, D):
    ks = jax.random.split(key, 17)

    def w(k, shape, scale=0.1):
        return (scale * jax.random.normal(k, shape)).astype(jnp.float32)

    return dict(
        embedding=w(ks[0], (dict_size, D)),
        wih=w(ks[1], (4, D, D)),      # per-gate W_ih^T (x @ W)
        whh=w(ks[2], (4, D, D)),      # per-gate W_hh^T
        blstm=w(ks[3], (4, 1, D)),    # b_ih + b_hh per gate
        wh_t=w(ks[4], (D, D)),        # W_h (no bias), transposed
        ws_t=w(ks[5], (D, D)),        # W_s weight, transposed
        bs=w(ks[6], (1, D)),          # W_s bias
        v=w(ks[7], (D, 1)),           # v_t
        vc=w(ks[8], (D, D)),          # V weight (context half), transposed
        vs=w(ks[9], (D, D)),          # V weight (cell half), transposed
        bv=w(ks[10], (1, D)),         # V bias
        vp_t=w(ks[11], (D, dict_size)),  # V_prime, transposed
        bvp=w(ks[12], (1, dict_size)),
        whp=w(ks[13], (D, 1)),        # W_h_prime_t
        wst=w(ks[14], (D, 1)),        # W_s_t weight
        bwst=w(ks[15], (1, 1)),       # W_s_t bias
        wxt=w(ks[16], (D, 1)),        # W_x_t
    )


def reference(params, words, lengths, pre_h, inp, input_len):
    """Pure numpy mirror of the torch forward() (cell init = zeros)."""
    p = {k: np.asarray(v) for k, v in params.items()}
    words = np.asarray(words); lengths = np.asarray(lengths)
    pre_h = np.asarray(pre_h); inp = np.asarray(inp); input_len = np.asarray(input_len)
    B, T = words.shape
    D = pre_h.shape[2]
    out = np.zeros((B, T - 1, 1), dtype=np.float32)
    emb = p["embedding"][words]

    def sig(x):
        return 1.0 / (1.0 + np.exp(-x))

    for b in range(B):
        il = int(input_len[b])
        hid = pre_h[b, il - 1][None, :]
        cell = np.zeros((1, D), dtype=np.float32)
        for j in range(int(lengths[b]) - 1):
            x = emb[b, j][None, :]
            x_next = emb[b, j + 1][None, :]
            g = [x @ p["wih"][k] + hid @ p["whh"][k] + p["blstm"][k] for k in range(4)]
            i_g, f_g, g_g, o_g = sig(g[0]), sig(g[1]), np.tanh(g[2]), sig(g[3])
            cell = f_g * cell + i_g * g_g
            hid = o_g * np.tanh(cell)
            prehv = pre_h[b, :il]
            e = np.tanh(prehv @ p["wh_t"] + cell @ p["ws_t"] + p["bs"]) @ p["v"]
            a = np.exp(e - e.max()); a = a / a.sum()
            context = (a * prehv).sum(axis=0, keepdims=True)
            hidden = context @ p["vc"] + cell @ p["vs"] + p["bv"]
            logits = hidden @ p["vp_t"] + p["bvp"]
            d = np.exp(logits - logits.max()); d = d / d.sum()
            p_gen = sig(context @ p["whp"] + cell @ p["wst"] + p["bwst"] + x_next @ p["wxt"])
            a_idx = float(a[inp[b, :il] == words[b, j], 0].sum())
            P_vocab = float(d[0, words[b, j + 1]])
            out[b, j, 0] = p_gen[0, 0] * P_vocab + (1.0 - p_gen[0, 0]) * a_idx
    return out


if __name__ == "__main__":
    key = jax.random.PRNGKey(0)
    # lane-aligned sizes: D and dict_size multiples of 128, S multiple of 8.
    B, T, S, D, dict_size = 16, 8, 16, 128, 256
    k1, k2, k3, k4, k5, kp = jax.random.split(key, 6)

    params = init_params(kp, dict_size, D)
    words = jax.random.randint(k1, (B, T), 2, dict_size, dtype=jnp.int32)
    inp = jax.random.randint(k2, (B, S), 2, dict_size, dtype=jnp.int32)
    # force a few pointer matches so the copy path is exercised
    inp = inp.at[0, 1].set(words[0, 0])
    inp = inp.at[1, 2].set(words[1, 1])
    inp = inp.at[2, 0].set(words[2, 3])
    pre_h = (0.1 * jax.random.normal(k3, (B, S, D))).astype(jnp.float32)
    lengths = jax.random.randint(k4, (B,), 2, T + 1, dtype=jnp.int32).at[0].set(T)
    input_len = jax.random.randint(k5, (B,), 1, S + 1, dtype=jnp.int32).at[0].set(S)

    out = pointer_gen_decoder(params, words, lengths, pre_h, inp, input_len)
    out = jax.block_until_ready(out)

    ref = reference(params, words, lengths, pre_h, inp, input_len)
    np.testing.assert_allclose(np.asarray(out), ref, atol=3e-3, rtol=3e-3)
    print("KERNEL_OK")
</pallas_src>

<mosaic_0001>
module attributes {stable_mosaic.version = 11 : i64} {
  func.func @pointer_gen_decoder_kernel(%arg0: i32, %arg1: memref<8x8x128xf32, #tpu.memory_space<vmem>>, %arg2: memref<8x16x128xf32, #tpu.memory_space<vmem>>, %arg3: memref<8x128xf32, #tpu.memory_space<vmem>>, %arg4: memref<8x16xi32, #tpu.memory_space<vmem>>, %arg5: memref<8x8x1xi32, #tpu.memory_space<vmem>>, %arg6: memref<8x1xi32, #tpu.memory_space<vmem>>, %arg7: memref<8x1xi32, #tpu.memory_space<vmem>>, %arg8: memref<128x512xf32, #tpu.memory_space<vmem>>, %arg9: memref<128x512xf32, #tpu.memory_space<vmem>>, %arg10: memref<1x512xf32, #tpu.memory_space<vmem>>, %arg11: memref<128x128xf32, #tpu.memory_space<vmem>>, %arg12: memref<1x128xf32, #tpu.memory_space<vmem>>, %arg13: memref<1x128xf32, #tpu.memory_space<vmem>>, %arg14: memref<128x257xf32, #tpu.memory_space<vmem>>, %arg15: memref<128x129xf32, #tpu.memory_space<vmem>>, %arg16: memref<1x128xf32, #tpu.memory_space<vmem>>, %arg17: memref<128x256xf32, #tpu.memory_space<vmem>>, %arg18: memref<1x256xf32, #tpu.memory_space<vmem>>, %arg19: memref<1x1xf32, #tpu.memory_space<vmem>>, %arg20: memref<128x1xf32, #tpu.memory_space<vmem>>, %arg21: memref<7x8x1xf32, #tpu.memory_space<vmem>>, %arg22: memref<8x16x128xf32, #tpu.memory_space<vmem>>, %arg23: memref<8x8x1xf32, #tpu.memory_space<vmem>>) attributes {dimension_semantics = [#tpu.dimension_semantics<parallel>], iteration_bounds = array<i64: 2>, scalar_prefetch = 0 : i64, scratch_operands = 2 : i64, tpu.core_type = #tpu.core_type<tc>, window_params = [{transform_indices = @transform_0, window_bounds = array<i64: 8, 8, 128>}, {transform_indices = @transform_1, window_bounds = array<i64: 8, 16, 128>}, {transform_indices = @transform_2, window_bounds = array<i64: 8, 128>}, {transform_indices = @transform_3, window_bounds = array<i64: 8, 16>}, {transform_indices = @transform_4, window_bounds = array<i64: 8, 8, 1>}, {transform_indices = @transform_5, window_bounds = array<i64: 8, 1>}, {transform_indices = @transform_6, window_bounds = array<i64: 8, 1>}, {pipeline_mode = #tpu.pipeline_mode<synchronous>, transform_indices = @transform_7, window_bounds = array<i64: 128, 512>}, {pipeline_mode = #tpu.pipeline_mode<synchronous>, transform_indices = @transform_8, window_bounds = array<i64: 128, 512>}, {pipeline_mode = #tpu.pipeline_mode<synchronous>, transform_indices = @transform_9, window_bounds = array<i64: 1, 512>}, {pipeline_mode = #tpu.pipeline_mode<synchronous>, transform_indices = @transform_10, window_bounds = array<i64: 128, 128>}, {pipeline_mode = #tpu.pipeline_mode<synchronous>, transform_indices = @transform_11, window_bounds = array<i64: 1, 128>}, {pipeline_mode = #tpu.pipeline_mode<synchronous>, transform_indices = @transform_12, window_bounds = array<i64: 1, 128>}, {pipeline_mode = #tpu.pipeline_mode<synchronous>, transform_indices = @transform_13, window_bounds = array<i64: 128, 257>}, {pipeline_mode = #tpu.pipeline_mode<synchronous>, transform_indices = @transform_14, window_bounds = array<i64: 128, 129>}, {pipeline_mode = #tpu.pipeline_mode<synchronous>, transform_indices = @transform_15, window_bounds = array<i64: 1, 128>}, {pipeline_mode = #tpu.pipeline_mode<synchronous>, transform_indices = @transform_16, window_bounds = array<i64: 128, 256>}, {pipeline_mode = #tpu.pipeline_mode<synchronous>, transform_indices = @transform_17, window_bounds = array<i64: 1, 256>}, {pipeline_mode = #tpu.pipeline_mode<synchronous>, transform_indices = @transform_18, window_bounds = array<i64: 1, 1>}, {pipeline_mode = #tpu.pipeline_mode<synchronous>, transform_indices = @transform_19, window_bounds = array<i64: 128, 1>}, {transform_indices = @transform_20, window_bounds = array<i64: 7, 8, 1>}]} {
    %c0 = arith.constant 0 : index
    %c0_0 = arith.constant 0 : index
    %0 = vector.load %arg7[%c0, %c0_0] : memref<8x1xi32, #tpu.memory_space<vmem>>, vector<8x1xi32>
    %c0_1 = arith.constant 0 : index
    %c0_2 = arith.constant 0 : index
    %1 = vector.load %arg6[%c0_1, %c0_2] : memref<8x1xi32, #tpu.memory_space<vmem>>, vector<8x1xi32>
    %c1_i32 = arith.constant 1 : i32
    %2 = vector.broadcast %c1_i32 : i32 to vector<8x1xi32>
    %3 = arith.subi %1, %2 : vector<8x1xi32>
    %c0_3 = arith.constant 0 : index
    %c0_4 = arith.constant 0 : index
    %4 = vector.load %arg4[%c0_3, %c0_4] : memref<8x16xi32, #tpu.memory_space<vmem>>, vector<8x16xi32>
    %5 = tpu.iota {dimensions = array<i32: 1>} : vector<1x16xi32>
    %6 = vector.broadcast %5 : vector<1x16xi32> to vector<8x16xi32>
    %7 = vector.broadcast %0 : vector<8x1xi32> to vector<8x16xi32>
    %8 = arith.cmpi slt, %6, %7 : vector<8x16xi32>
    %9 = tpu.iota {dimensions = array<i32: 1>} : vector<1x256xi32>
    %c0_5 = arith.constant 0 : index
    %c0_6 = arith.constant 0 : index
    %c0_7 = arith.constant 0 : index
    %10 = vector.load %arg2[%c0_5, %c0_6, %c0_7] : memref<8x16x128xf32, #tpu.memory_space<vmem>>, vector<8x16x128xf32>
    %11 = vector.shape_cast %10 : vector<8x16x128xf32> to vector<128x128xf32>
    %c0_8 = arith.constant 0 : index
    %c0_9 = arith.constant 0 : index
    %12 = vector.load %arg11[%c0_8, %c0_9] : memref<128x128xf32, #tpu.memory_space<vmem>>, vector<128x128xf32>
    %cst = arith.constant dense<0.000000e+00> : vector<128x128xf32>
    %13 = tpu.matmul %11, %12, %cst {dimension_numbers = #tpu.dot_dimension_numbers<[1], [0], [0], [1], [0, 0, 1, 1], [], []>} : vector<128x128xf32>, vector<128x128xf32>, vector<128x128xf32> -> vector<128x128xf32>
    %c0_10 = arith.constant 0 : index
    %c0_11 = arith.constant 0 : index
    %14 = vector.load %arg12[%c0_10, %c0_11] : memref<1x128xf32, #tpu.memory_space<vmem>>, vector<1x128xf32>
    %15 = vector.broadcast %14 : vector<1x128xf32> to vector<128x128xf32>
    %16 = arith.addf %13, %15 : vector<128x128xf32>
    %17 = vector.shape_cast %16 : vector<128x128xf32> to vector<8x16x128xf32>
    %c0_12 = arith.constant 0 : index
    %c0_13 = arith.constant 0 : index
    %c0_14 = arith.constant 0 : index
    %18 = vector.load %arg22[%c0_12, %c0_13, %c0_14] : memref<8x16x128xf32, #tpu.memory_space<vmem>>, vector<8x16x128xf32>
    tpu.vector_store %arg22[%c0_12, %c0_13, %c0_14], %17 {strides = array<i32>} : memref<8x16x128xf32, #tpu.memory_space<vmem>>, vector<8x16x128xf32>,
    %c0_15 = arith.constant 0 : index
    %c0_16 = arith.constant 0 : index
    %c0_17 = arith.constant 0 : index
    %19 = vector.load %arg1[%c0_15, %c0_16, %c0_17] : memref<8x8x128xf32, #tpu.memory_space<vmem>>, vector<8x8x128xf32>
    %20 = vector.shape_cast %19 : vector<8x8x128xf32> to vector<64x128xf32>
    %c0_18 = arith.constant 0 : index
    %c0_19 = arith.constant 0 : index
    %21 = vector.load %arg20[%c0_18, %c0_19] : memref<128x1xf32, #tpu.memory_space<vmem>>, vector<128x1xf32>
    %cst_20 = arith.constant dense<0.000000e+00> : vector<64x1xf32>
    %22 = tpu.matmul %20, %21, %cst_20 {dimension_numbers = #tpu.dot_dimension_numbers<[1], [0], [0], [1], [0, 0, 1, 1], [], []>} : vector<64x128xf32>, vector<128x1xf32>, vector<64x1xf32> -> vector<64x1xf32>
    %23 = vector.shape_cast %22 : vector<64x1xf32> to vector<8x8x1xf32>
    %c0_21 = arith.constant 0 : index
    %c0_22 = arith.constant 0 : index
    %c0_23 = arith.constant 0 : index
    %24 = vector.load %arg23[%c0_21, %c0_22, %c0_23] : memref<8x8x1xf32, #tpu.memory_space<vmem>>, vector<8x8x1xf32>
    tpu.vector_store %arg23[%c0_21, %c0_22, %c0_23], %23 {strides = array<i32>} : memref<8x8x1xf32, #tpu.memory_space<vmem>>, vector<8x8x1xf32>,
    %c0_24 = arith.constant 0 : index
    %c0_25 = arith.constant 0 : index
    %25 = vector.load %arg13[%c0_24, %c0_25] : memref<1x128xf32, #tpu.memory_space<vmem>>, vector<1x128xf32>
    %26 = vector.shape_cast %25 : vector<1x128xf32> to vector<1x1x128xf32>
    %c0_26 = arith.constant 0 : index
    %c0_27 = arith.constant 0 : index
    %27 = vector.load %arg10[%c0_26, %c0_27] : memref<1x512xf32, #tpu.memory_space<vmem>>, vector<1x512xf32>
    %c0_28 = arith.constant 0 : index
    %c0_29 = arith.constant 0 : index
    %28 = vector.load %arg16[%c0_28, %c0_29] : memref<1x128xf32, #tpu.memory_space<vmem>>, vector<1x128xf32>
    %c0_30 = arith.constant 0 : index
    %c0_31 = arith.constant 0 : index
    %29 = vector.load %arg18[%c0_30, %c0_31] : memref<1x256xf32, #tpu.memory_space<vmem>>, vector<1x256xf32>
    %c0_32 = arith.constant 0 : index
    %c0_33 = arith.constant 0 : index
    %30 = vector.load %arg19[%c0_32, %c0_33] : memref<1x1xf32, #tpu.memory_space<vmem>>, vector<1x1xf32>
    %cst_34 = arith.constant 0.000000e+00 : f32
    %31 = vector.broadcast %cst_34 : f32 to vector<8x128xf32>
    %c0_35 = arith.constant 0 : index
    %c0_36 = arith.constant 0 : index
    %32 = vector.load %arg3[%c0_35, %c0_36] : memref<8x128xf32, #tpu.memory_space<vmem>>, vector<8x128xf32>
    %cst_37 = arith.constant -1.000000e+30 : f32
    %c0_i32 = arith.constant 0 : i32
    %c7_i32 = arith.constant 7 : i32
    %33 = arith.addi %c0_i32, %c7_i32 : i32
    %c1_i32_38 = arith.constant 1 : i32
    %34:2 = scf.for %arg24 = %c0_i32 to %33 step %c1_i32_38 iter_args(%arg25 = %32, %arg26 = %31) -> (vector<8x128xf32>, vector<8x128xf32>)  : i32 {
      %35 = vector.broadcast %arg24 : i32 to vector<8x1xi32>
      %36 = arith.cmpi slt, %35, %3 : vector<8x1xi32>
      %37 = arith.index_cast %arg24 : i32 to index
      %c0_40 = arith.constant 0 : index
      %c0_41 = arith.constant 0 : index
      %38 = vector.load %arg1[%37, %c0_40, %c0_41] : memref<8x8x128xf32, #tpu.memory_space<vmem>>, vector<1x8x128xf32>
      %39 = vector.shape_cast %38 : vector<1x8x128xf32> to vector<8x128xf32>
      %40 = arith.index_cast %arg24 : i32 to index
      %c0_42 = arith.constant 0 : index
      %c0_43 = arith.constant 0 : index
      %41 = vector.load %arg5[%40, %c0_42, %c0_43] : memref<8x8x1xi32, #tpu.memory_space<vmem>>, vector<1x8x1xi32>
      %42 = vector.shape_cast %41 : vector<1x8x1xi32> to vector<8x1xi32>
      %c1_i32_44 = arith.constant 1 : i32
      %43 = arith.addi %arg24, %c1_i32_44 : i32
      %44 = arith.index_cast %43 : i32 to index
      %c0_45 = arith.constant 0 : index
      %c0_46 = arith.constant 0 : index
      %45 = vector.load %arg5[%44, %c0_45, %c0_46] : memref<8x8x1xi32, #tpu.memory_space<vmem>>, vector<1x8x1xi32>
      %46 = vector.shape_cast %45 : vector<1x8x1xi32> to vector<8x1xi32>
      %c0_47 = arith.constant 0 : index
      %c0_48 = arith.constant 0 : index
      %47 = vector.load %arg8[%c0_47, %c0_48] : memref<128x512xf32, #tpu.memory_space<vmem>>, vector<128x512xf32>
      %cst_49 = arith.constant dense<0.000000e+00> : vector<8x512xf32>
      %48 = tpu.matmul %39, %47, %cst_49 {dimension_numbers = #tpu.dot_dimension_numbers<[1], [0], [0], [1], [0, 0, 1, 1], [], []>} : vector<8x128xf32>, vector<128x512xf32>, vector<8x512xf32> -> vector<8x512xf32>
      %c0_50 = arith.constant 0 : index
      %c0_51 = arith.constant 0 : index
      %49 = vector.load %arg9[%c0_50, %c0_51] : memref<128x512xf32, #tpu.memory_space<vmem>>, vector<128x512xf32>
      %cst_52 = arith.constant dense<0.000000e+00> : vector<8x512xf32>
      %50 = tpu.matmul %arg25, %49, %cst_52 {dimension_numbers = #tpu.dot_dimension_numbers<[1], [0], [0], [1], [0, 0, 1, 1], [], []>} : vector<8x128xf32>, vector<128x512xf32>, vector<8x512xf32> -> vector<8x512xf32>
      %51 = arith.addf %48, %50 : vector<8x512xf32>
      %52 = vector.broadcast %27 : vector<1x512xf32> to vector<8x512xf32>
      %53 = arith.addf %51, %52 : vector<8x512xf32>
      %54 = vector.extract_strided_slice %53 {offsets = [0, 0], sizes = [8, 128], strides = [1, 1]} : vector<8x512xf32> to vector<8x128xf32>
      %55 = arith.negf %54 : vector<8x128xf32>
      %56 = math.exp %55 : vector<8x128xf32>
      %cst_53 = arith.constant 1.000000e+00 : f32
      %57 = vector.broadcast %cst_53 : f32 to vector<8x128xf32>
      %58 = arith.addf %57, %56 : vector<8x128xf32>
      %59 = arith.divf %57, %58 : vector<8x128xf32>
      %60 = vector.extract_strided_slice %53 {offsets = [0, 128], sizes = [8, 128], strides = [1, 1]} : vector<8x512xf32> to vector<8x128xf32>
      %61 = arith.negf %60 : vector<8x128xf32>
      %62 = math.exp %61 : vector<8x128xf32>
      %cst_54 = arith.constant 1.000000e+00 : f32
      %63 = vector.broadcast %cst_54 : f32 to vector<8x128xf32>
      %64 = arith.addf %63, %62 : vector<8x128xf32>
      %65 = arith.divf %63, %64 : vector<8x128xf32>
      %66 = vector.extract_strided_slice %53 {offsets = [0, 256], sizes = [8, 128], strides = [1, 1]} : vector<8x512xf32> to vector<8x128xf32>
      %67 = math.tanh %66 : vector<8x128xf32>
      %68 = vector.extract_strided_slice %53 {offsets = [0, 384], sizes = [8, 128], strides = [1, 1]} : vector<8x512xf32> to vector<8x128xf32>
      %69 = arith.negf %68 : vector<8x128xf32>
      %70 = math.exp %69 : vector<8x128xf32>
      %cst_55 = arith.constant 1.000000e+00 : f32
      %71 = vector.broadcast %cst_55 : f32 to vector<8x128xf32>
      %72 = arith.addf %71, %70 : vector<8x128xf32>
      %73 = arith.divf %71, %72 : vector<8x128xf32>
      %74 = arith.mulf %65, %arg26 : vector<8x128xf32>
      %75 = arith.mulf %59, %67 : vector<8x128xf32>
      %76 = arith.addf %74, %75 : vector<8x128xf32>
      %77 = math.tanh %76 : vector<8x128xf32>
      %78 = arith.mulf %73, %77 : vector<8x128xf32>
      %c0_56 = arith.constant 0 : index
      %c0_57 = arith.constant 0 : index
      %79 = vector.load %arg14[%c0_56, %c0_57] : memref<128x257xf32, #tpu.memory_space<vmem>>, vector<128x257xf32>
      %cst_58 = arith.constant dense<0.000000e+00> : vector<8x257xf32>
      %80 = tpu.matmul %76, %79, %cst_58 {dimension_numbers = #tpu.dot_dimension_numbers<[1], [0], [0], [1], [0, 0, 1, 1], [], []>} : vector<8x128xf32>, vector<128x257xf32>, vector<8x257xf32> -> vector<8x257xf32>
      %81 = vector.extract_strided_slice %80 {offsets = [0, 0], sizes = [8, 128], strides = [1, 1]} : vector<8x257xf32> to vector<8x128xf32>
      %82 = vector.extract_strided_slice %80 {offsets = [0, 128], sizes = [8, 128], strides = [1, 1]} : vector<8x257xf32> to vector<8x128xf32>
      %83 = vector.extract_strided_slice %80 {offsets = [0, 256], sizes = [8, 1], strides = [1, 1]} : vector<8x257xf32> to vector<8x1xf32>
      %c0_59 = arith.constant 0 : index
      %c0_60 = arith.constant 0 : index
      %c0_61 = arith.constant 0 : index
      %84 = vector.load %arg22[%c0_59, %c0_60, %c0_61] : memref<8x16x128xf32, #tpu.memory_space<vmem>>, vector<8x16x128xf32>
      %85 = vector.shape_cast %81 : vector<8x128xf32> to vector<8x1x128xf32>
      %86 = vector.broadcast %85 : vector<8x1x128xf32> to vector<8x16x128xf32>
      %87 = arith.addf %84, %86 : vector<8x16x128xf32>
      %88 = math.tanh %87 : vector<8x16x128xf32>
      %89 = vector.broadcast %26 : vector<1x1x128xf32> to vector<8x16x128xf32>
      %90 = arith.mulf %88, %89 : vector<8x16x128xf32>
      %cst_62 = arith.constant dense<0.000000e+00> : vector<8x16xf32>
      %91 = vector.multi_reduction <add>, %90, %cst_62 [2] : vector<8x16x128xf32> to vector<8x16xf32>
      %92 = vector.broadcast %cst_37 : f32 to vector<8x16xf32>
      %93 = arith.select %8, %91, %92 : vector<8x16xi1>, vector<8x16xf32>
      %cst_63 = arith.constant dense<0xFF800000> : vector<8xf32>
      %94 = vector.multi_reduction <maximumf>, %93, %cst_63 [1] : vector<8x16xf32> to vector<8xf32>
      %95 = vector.shape_cast %94 : vector<8xf32> to vector<8x1xf32>
      %96 = vector.broadcast %95 : vector<8x1xf32> to vector<8x16xf32>
      %97 = arith.subf %93, %96 : vector<8x16xf32>
      %98 = math.exp %97 : vector<8x16xf32>
      %cst_64 = arith.constant dense<0.000000e+00> : vector<8xf32>
      %99 = vector.multi_reduction <add>, %98, %cst_64 [1] : vector<8x16xf32> to vector<8xf32>
      %100 = vector.shape_cast %99 : vector<8xf32> to vector<8x1xf32>
      %101 = vector.broadcast %100 : vector<8x1xf32> to vector<8x16xf32>
      %102 = arith.divf %98, %101 : vector<8x16xf32>
      %103 = vector.shape_cast %102 : vector<8x16xf32> to vector<8x16x1xf32>
      %c0_65 = arith.constant 0 : index
      %c0_66 = arith.constant 0 : index
      %c0_67 = arith.constant 0 : index
      %104 = vector.load %arg2[%c0_65, %c0_66, %c0_67] : memref<8x16x128xf32, #tpu.memory_space<vmem>>, vector<8x16x128xf32>
      %105 = vector.broadcast %103 : vector<8x16x1xf32> to vector<8x16x128xf32>
      %106 = arith.mulf %105, %104 : vector<8x16x128xf32>
      %cst_68 = arith.constant dense<0.000000e+00> : vector<8x128xf32>
      %107 = vector.multi_reduction <add>, %106, %cst_68 [1] : vector<8x16x128xf32> to vector<8x128xf32>
      %c0_69 = arith.constant 0 : index
      %c0_70 = arith.constant 0 : index
      %108 = vector.load %arg15[%c0_69, %c0_70] : memref<128x129xf32, #tpu.memory_space<vmem>>, vector<128x129xf32>
      %cst_71 = arith.constant dense<0.000000e+00> : vector<8x129xf32>
      %109 = tpu.matmul %107, %108, %cst_71 {dimension_numbers = #tpu.dot_dimension_numbers<[1], [0], [0], [1], [0, 0, 1, 1], [], []>} : vector<8x128xf32>, vector<128x129xf32>, vector<8x129xf32> -> vector<8x129xf32>
      %110 = vector.extract_strided_slice %109 {offsets = [0, 0], sizes = [8, 128], strides = [1, 1]} : vector<8x129xf32> to vector<8x128xf32>
      %111 = arith.addf %110, %82 : vector<8x128xf32>
      %112 = vector.broadcast %28 : vector<1x128xf32> to vector<8x128xf32>
      %113 = arith.addf %111, %112 : vector<8x128xf32>
      %c0_72 = arith.constant 0 : index
      %c0_73 = arith.constant 0 : index
      %114 = vector.load %arg17[%c0_72, %c0_73] : memref<128x256xf32, #tpu.memory_space<vmem>>, vector<128x256xf32>
      %cst_74 = arith.constant dense<0.000000e+00> : vector<8x256xf32>
      %115 = tpu.matmul %113, %114, %cst_74 {dimension_numbers = #tpu.dot_dimension_numbers<[1], [0], [0], [1], [0, 0, 1, 1], [], []>} : vector<8x128xf32>, vector<128x256xf32>, vector<8x256xf32> -> vector<8x256xf32>
      %116 = vector.broadcast %29 : vector<1x256xf32> to vector<8x256xf32>
      %117 = arith.addf %115, %116 : vector<8x256xf32>
      %cst_75 = arith.constant dense<0xFF800000> : vector<8xf32>
      %118 = vector.multi_reduction <maximumf>, %117, %cst_75 [1] : vector<8x256xf32> to vector<8xf32>
      %119 = vector.shape_cast %118 : vector<8xf32> to vector<8x1xf32>
      %120 = vector.broadcast %119 : vector<8x1xf32> to vector<8x256xf32>
      %121 = arith.subf %117, %120 : vector<8x256xf32>
      %122 = math.exp %121 : vector<8x256xf32>
      %cst_76 = arith.constant dense<0.000000e+00> : vector<8xf32>
      %123 = vector.multi_reduction <add>, %122, %cst_76 [1] : vector<8x256xf32> to vector<8xf32>
      %124 = vector.shape_cast %123 : vector<8xf32> to vector<8x1xf32>
      %c1_i32_77 = arith.constant 1 : i32
      %125 = arith.addi %arg24, %c1_i32_77 : i32
      %126 = arith.index_cast %125 : i32 to index
      %c0_78 = arith.constant 0 : index
      %c0_79 = arith.constant 0 : index
      %127 = vector.load %arg23[%126, %c0_78, %c0_79] : memref<8x8x1xf32, #tpu.memory_space<vmem>>, vector<1x8x1xf32>
      %128 = vector.shape_cast %127 : vector<1x8x1xf32> to vector<8x1xf32>
      %129 = vector.extract_strided_slice %109 {offsets = [0, 128], sizes = [8, 1], strides = [1, 1]} : vector<8x129xf32> to vector<8x1xf32>
      %130 = arith.addf %129, %83 : vector<8x1xf32>
      %131 = vector.broadcast %30 : vector<1x1xf32> to vector<8x1xf32>
      %132 = arith.addf %130, %131 : vector<8x1xf32>
      %133 = arith.addf %132, %128 : vector<8x1xf32>
      %134 = arith.negf %133 : vector<8x1xf32>
      %135 = math.exp %134 : vector<8x1xf32>
      %cst_80 = arith.constant 1.000000e+00 : f32
      %136 = vector.broadcast %cst_80 : f32 to vector<8x1xf32>
      %137 = arith.addf %136, %135 : vector<8x1xf32>
      %138 = arith.divf %136, %137 : vector<8x1xf32>
      %139 = vector.broadcast %42 : vector<8x1xi32> to vector<8x16xi32>
      %140 = arith.cmpi eq, %4, %139 : vector<8x16xi32>
      %141 = arith.andi %140, %8 : vector<8x16xi1>
      %cst_81 = arith.constant 0.000000e+00 : f32
      %142 = vector.broadcast %cst_81 : f32 to vector<8x16xf32>
      %143 = arith.select %141, %102, %142 : vector<8x16xi1>, vector<8x16xf32>
      %cst_82 = arith.constant dense<0.000000e+00> : vector<8xf32>
      %144 = vector.multi_reduction <add>, %143, %cst_82 [1] : vector<8x16xf32> to vector<8xf32>
      %145 = vector.shape_cast %144 : vector<8xf32> to vector<8x1xf32>
      %146 = vector.broadcast %9 : vector<1x256xi32> to vector<8x256xi32>
      %147 = vector.broadcast %46 : vector<8x1xi32> to vector<8x256xi32>
      %148 = arith.cmpi eq, %146, %147 : vector<8x256xi32>
      %cst_83 = arith.constant 0.000000e+00 : f32
      %149 = vector.broadcast %cst_83 : f32 to vector<8x256xf32>
      %150 = arith.select %148, %122, %149 : vector<8x256xi1>, vector<8x256xf32>
      %cst_84 = arith.constant dense<0.000000e+00> : vector<8xf32>
      %151 = vector.multi_reduction <add>, %150, %cst_84 [1] : vector<8x256xf32> to vector<8xf32>
      %152 = vector.shape_cast %151 : vector<8xf32> to vector<8x1xf32>
      %153 = arith.divf %152, %124 : vector<8x1xf32>
      %154 = arith.mulf %138, %153 : vector<8x1xf32>
      %cst_85 = arith.constant 1.000000e+00 : f32
      %155 = vector.broadcast %cst_85 : f32 to vector<8x1xf32>
      %156 = arith.subf %155, %138 : vector<8x1xf32>
      %157 = arith.mulf %156, %145 : vector<8x1xf32>
      %158 = arith.addf %154, %157 : vector<8x1xf32>
      %cst_86 = arith.constant 0.000000e+00 : f32
      %159 = vector.broadcast %cst_86 : f32 to vector<8x1xf32>
      %160 = arith.select %36, %158, %159 : vector<8x1xi1>, vector<8x1xf32>
      %161 = arith.index_cast %arg24 : i32 to index
      %c0_87 = arith.constant 0 : index
      %c0_88 = arith.constant 0 : index
      %162 = vector.load %arg21[%161, %c0_87, %c0_88] : memref<7x8x1xf32, #tpu.memory_space<vmem>>, vector<1x8x1xf32>
      %163 = vector.shape_cast %162 : vector<1x8x1xf32> to vector<8x1xf32>
      %164 = vector.shape_cast %160 : vector<8x1xf32> to vector<1x8x1xf32>
      tpu.vector_store %arg21[%161, %c0_87, %c0_88], %164 {strides = array<i32>} : memref<7x8x1xf32, #tpu.memory_space<vmem>>, vector<1x8x1xf32>,
      %165 = vector.shape_cast %36 : vector<8x1xi1> to vector<8x1xi1>
      %166 = vector.broadcast %165 : vector<8x1xi1> to vector<8x128xi1>
      %167 = arith.select %166, %78, %arg25 : vector<8x128xi1>, vector<8x128xf32>
      %168 = vector.shape_cast %36 : vector<8x1xi1> to vector<8x1xi1>
      %169 = vector.broadcast %168 : vector<8x1xi1> to vector<8x128xi1>
      %170 = arith.select %169, %76, %arg26 : vector<8x128xi1>, vector<8x128xf32>
      scf.yield %167, %170 : vector<8x128xf32>, vector<8x128xf32>
    }
    %c7_i32_39 = arith.constant 7 : i32
    return
  }
  func.func @transform_0(%arg0: i32) -> (i32, i32, i32) {
    %c0_i32 = arith.constant 0 : i32
    %c0_i32_0 = arith.constant 0 : i32
    %c0_i32_1 = arith.constant 0 : i32
    return %c0_i32, %arg0, %c0_i32_0 : i32, i32, i32
  }
  func.func @transform_1(%arg0: i32) -> (i32, i32, i32) {
    %c0_i32 = arith.constant 0 : i32
    %c0_i32_0 = arith.constant 0 : i32
    %c0_i32_1 = arith.constant 0 : i32
    return %arg0, %c0_i32, %c0_i32_0 : i32, i32, i32
  }
  func.func @transform_2(%arg0: i32) -> (i32, i32) {
    %c0_i32 = arith.constant 0 : i32
    %c0_i32_0 = arith.constant 0 : i32
    return %arg0, %c0_i32 : i32, i32
  }
  func.func @transform_3(%arg0: i32) -> (i32, i32) {
    %c0_i32 = arith.constant 0 : i32
    %c0_i32_0 = arith.constant 0 : i32
    return %arg0, %c0_i32 : i32, i32
  }
  func.func @transform_4(%arg0: i32) -> (i32, i32, i32) {
    %c0_i32 = arith.constant 0 : i32
    %c0_i32_0 = arith.constant 0 : i32
    %c0_i32_1 = arith.constant 0 : i32
    return %c0_i32, %arg0, %c0_i32_0 : i32, i32, i32
  }
  func.func @transform_5(%arg0: i32) -> (i32, i32) {
    %c0_i32 = arith.constant 0 : i32
    %c0_i32_0 = arith.constant 0 : i32
    return %arg0, %c0_i32 : i32, i32
  }
  func.func @transform_6(%arg0: i32) -> (i32, i32) {
    %c0_i32 = arith.constant 0 : i32
    %c0_i32_0 = arith.constant 0 : i32
    return %arg0, %c0_i32 : i32, i32
  }
  func.func @transform_7(%arg0: i32) -> (i32, i32) {
    %c0_i32 = arith.constant 0 : i32
    %c0_i32_0 = arith.constant 0 : i32
    %c0_i32_1 = arith.constant 0 : i32
    return %c0_i32, %c0_i32_0 : i32, i32
  }
  func.func @transform_8(%arg0: i32) -> (i32, i32) {
    %c0_i32 = arith.constant 0 : i32
    %c0_i32_0 = arith.constant 0 : i32
    %c0_i32_1 = arith.constant 0 : i32
    return %c0_i32, %c0_i32_0 : i32, i32
  }
  func.func @transform_9(%arg0: i32) -> (i32, i32) {
    %c0_i32 = arith.constant 0 : i32
    %c0_i32_0 = arith.constant 0 : i32
    %c0_i32_1 = arith.constant 0 : i32
    return %c0_i32, %c0_i32_0 : i32, i32
  }
  func.func @transform_10(%arg0: i32) -> (i32, i32) {
    %c0_i32 = arith.constant 0 : i32
    %c0_i32_0 = arith.constant 0 : i32
    %c0_i32_1 = arith.constant 0 : i32
    return %c0_i32, %c0_i32_0 : i32, i32
  }
  func.func @transform_11(%arg0: i32) -> (i32, i32) {
    %c0_i32 = arith.constant 0 : i32
    %c0_i32_0 = arith.constant 0 : i32
    %c0_i32_1 = arith.constant 0 : i32
    return %c0_i32, %c0_i32_0 : i32, i32
  }
  func.func @transform_12(%arg0: i32) -> (i32, i32) {
    %c0_i32 = arith.constant 0 : i32
    %c0_i32_0 = arith.constant 0 : i32
    %c0_i32_1 = arith.constant 0 : i32
    return %c0_i32, %c0_i32_0 : i32, i32
  }
  func.func @transform_13(%arg0: i32) -> (i32, i32) {
    %c0_i32 = arith.constant 0 : i32
    %c0_i32_0 = arith.constant 0 : i32
    %c0_i32_1 = arith.constant 0 : i32
    return %c0_i32, %c0_i32_0 : i32, i32
  }
  func.func @transform_14(%arg0: i32) -> (i32, i32) {
    %c0_i32 = arith.constant 0 : i32
    %c0_i32_0 = arith.constant 0 : i32
    %c0_i32_1 = arith.constant 0 : i32
    return %c0_i32, %c0_i32_0 : i32, i32
  }
  func.func @transform_15(%arg0: i32) -> (i32, i32) {
    %c0_i32 = arith.constant 0 : i32
    %c0_i32_0 = arith.constant 0 : i32
    %c0_i32_1 = arith.constant 0 : i32
    return %c0_i32, %c0_i32_0 : i32, i32
  }
  func.func @transform_16(%arg0: i32) -> (i32, i32) {
    %c0_i32 = arith.constant 0 : i32
    %c0_i32_0 = arith.constant 0 : i32
    %c0_i32_1 = arith.constant 0 : i32
    return %c0_i32, %c0_i32_0 : i32, i32
  }
  func.func @transform_17(%arg0: i32) -> (i32, i32) {
    %c0_i32 = arith.constant 0 : i32
    %c0_i32_0 = arith.constant 0 : i32
    %c0_i32_1 = arith.constant 0 : i32
    return %c0_i32, %c0_i32_0 : i32, i32
  }
  func.func @transform_18(%arg0: i32) -> (i32, i32) {
    %c0_i32 = arith.constant 0 : i32
    %c0_i32_0 = arith.constant 0 : i32
    %c0_i32_1 = arith.constant 0 : i32
    return %c0_i32, %c0_i32_0 : i32, i32
  }
  func.func @transform_19(%arg0: i32) -> (i32, i32) {
    %c0_i32 = arith.constant 0 : i32
    %c0_i32_0 = arith.constant 0 : i32
    %c0_i32_1 = arith.constant 0 : i32
    return %c0_i32, %c0_i32_0 : i32, i32
  }
  func.func @transform_20(%arg0: i32) -> (i32, i32, i32) {
    %c0_i32 = arith.constant 0 : i32
    %c0_i32_0 = arith.constant 0 : i32
    %c0_i32_1 = arith.constant 0 : i32
    return %c0_i32, %arg0, %c0_i32_0 : i32, i32, i32
  }
}

</mosaic_0001>

<bundles_post_ra>
// kernel: tpu_custom_call.1
= control target key start
LH: loop header
LB: loop body
LE: loop exit
PB: predicated region body
PF: predicated region fallthrough
CT: control target
= control target key end

     0   :  { %s5226_s0 = inlined_call_operand.hbm [shape: f32[8,16,128], index: 0, kind: input, shape index: {}]   ;;  %s5227_s1 = inlined_call_operand.hbm [shape: f32[16,16,128], index: 1, kind: input, shape index: {}]   ;;  %s5228_s2 = inlined_call_operand.vmem [shape: f32[16,128], index: 2, kind: input, shape index: {}]   ;;  %s5229_s3 = inlined_call_operand.vmem [shape: s32[16,16], index: 3, kind: input, shape index: {}]   ;;  %s5230_s4 = inlined_call_operand.vmem [shape: s32[8,16,1], index: 4, kind: input, shape index: {}]   ;;  %s5231_s5 = inlined_call_operand.vmem [shape: s32[16,1], index: 5, kind: input, shape index: {}]   ;;  %s5232_s6 = inlined_call_operand.vmem [shape: s32[16,1], index: 6, kind: input, shape index: {}]   ;;  %s5233_s7 = inlined_call_operand.vmem [shape: f32[128,512], index: 7, kind: input, shape index: {}]   ;;  %s5234_s8 = inlined_call_operand.vmem [shape: f32[128,512], index: 8, kind: input, shape index: {}]   ;;  %s5235_s9 = inlined_call_operand.vmem [shape: f32[1,512], index: 9, kind: input, shape index: {}]   ;;  %s5236_s10 = inlined_call_operand.hbm [shape: f32[128,128], index: 10, kind: input, shape index: {}]   ;;  %s5237_s11 = inlined_call_operand.vmem [shape: f32[1,128], index: 11, kind: input, shape index: {}]   ;;  %s5238_s12 = inlined_call_operand.vmem [shape: f32[1,128], index: 12, kind: input, shape index: {}]   ;;  %s5239_s13 = inlined_call_operand.vmem [shape: f32[128,257], index: 13, kind: input, shape index: {}]   ;;  %s5240_s14 = inlined_call_operand.vmem [shape: f32[128,129], index: 14, kind: input, shape index: {}]   ;;  %s5241_s15 = inlined_call_operand.vmem [shape: f32[1,128], index: 15, kind: input, shape index: {}]   ;;  %s5242_s16 = inlined_call_operand.hbm [shape: f32[128,256], index: 16, kind: input, shape index: {}]   ;;  %s5243_s17 = inlined_call_operand.vmem [shape: f32[1,256], index: 17, kind: input, shape index: {}]   ;;  %s5244_s18 = inlined_call_operand.<no memory space> [shape: f32[1,1], index: 18, kind: input, shape index: {}]   ;;  %s5245_s19 = inlined_call_operand.vmem [shape: f32[128,1], index: 19, kind: input, shape index: {}]   ;;  %s5246_s20 = inlined_call_operand.vmem [shape: f32[7,16,1], index: 20, kind: output, shape index: {}]  }
   0x1   :  { %5263 = sst [smem:[#allocation22_spill]] %s5226_s0  ;;  %v25_v0 = vstv %s5244_s18 }
   0x2   :  { %5264 = sst [smem:[#allocation23_spill]] %s5227_s1  ;;  %26 = vst [vmem:[#allocation4] sm:$0x1] %v25_v0 }
   0x3   :  { %5265 = sst [smem:[#allocation24_spill]] %s5228_s2 }
   0x4   :  { %5266 = sst [smem:[#allocation25_spill]] %s5229_s3 }
   0x5   :  { %5267 = sst [smem:[#allocation26_spill]] %s5230_s4 }
   0x6   :  { %5268 = sst [smem:[#allocation27_spill]] %s5233_s7 }
   0x7   :  { %5269 = sst [smem:[#allocation28_spill]] %s5234_s8 }
   0x8   :  { %5270 = sst [smem:[#allocation29_spill]] %s5236_s10 }
   0x9   :  { %5271 = sst [smem:[#allocation30_spill]] %s5237_s11 }
   0xa   :  { %5272 = sst [smem:[#allocation31_spill]] %s5239_s13 }
   0xb   :  { %5273 = sst [smem:[#allocation32_spill]] %s5240_s14 }
   0xc   :  { %5274 = sst [smem:[#allocation33_spill]] %s5242_s16 }
   0xd   :  { %5275 = sst [smem:[#allocation34_spill]] %s5246_s20 }
   0xe   :  { %27 = vsyncpa [#allocation6], 0 }
   0xf   :  { %29 = vsyncpa [#allocation6 + $0x1], 0 }
  0x10   :  { %30 = vsyncpa [#allocation8], 0 }
  0x11   :  { %32 = vsyncpa [#allocation8 + $0x1], 0 }
  0x12   :  { %33 = vsyncpa [#allocation12], 0  ;;  %s3974_s23 = smov 0   ;;  %s3976_s24 = smov 0  }
  0x13   :  { %s3978_s2 = smov 0   ;;  %s3980_s25 = smov 0  }
  0x14 LB: > { %5276 = sst [smem:[#allocation18_spill]] %s3831_s2  ;;  %s3993_s18 = sadd.s32 4294967295, %s3835_s25   ;;  %s3835_s25 = sphi %s3980_s25, %s5311_s25   ;;  %s3831_s2 = sphi %s3978_s2, %s5313_s2   ;;  %s3827_s24 = sphi %s3976_s24, %s5315_s24   ;;  %s3823_s23 = sphi %s3974_s23, %s5314_s23  }
  0x15   : > { %s3996_s3 = sadd.s32 1, %s3835_s25   ;;  %s46_s27 = sadd.s32 1, %s3831_s2 }
  0x16   : > { %5277 = sst [smem:[#allocation19_spill]] %s3996_s3  ;;  %s43_s26 = ssub.s32 %s3835_s25, %s3996_s3 }
  0x17   : > { %p44_p0 = scmp.eq.s32.totalorder %s43_s26, 0  ;;  %p53_p1 = scmp.ne.s32.totalorder %s3831_s2, %s3827_s24 }
  0x18   : > { %p54_p2 = scmp.eq.s32.totalorder %s3835_s25, 0  ;;  %p59_p3 = scmp.ne.s32.totalorder %s3827_s24, %s3823_s23 }
  0x19   : > { %s4006_s28 = scalar_select %p44_p0, %s3831_s2, %s46_s27  }
  0x1a   : > { %p4008_p4 = por %p54_p2, %p53_p1  ;;  %p5253_p5 = scmp.eq.s32.totalorder %s3993_s18, 0 }
  0x1b   : > { %5278 = sst [smem:[#allocation20_spill]] %s4006_s28  ;;  %p512_p6 = scmp.eq.s32.totalorder %s3993_s18, 1 }
  0x1c   : > { %s5279_s4 = scalar_select %p4008_p4, 1, 0 }
  0x1d   : > { %p2940_p7 = scmp.ge.s32.totalorder %s3835_s25, 1  ;;  %p4017_p8 = por %p5253_p5, %p59_p3 }
  0x1e   : > { %p525_p9 = scmp.lt.s32.totalorder %s3835_s25, 3  ;;  %p4022_p10 = por %p512_p6, %p53_p1 }
  0x1f   : > { %s5280_s29 = scalar_select %p4017_p8, 1, 0 }
  0x20   : > { %s5281_s30 = scalar_select %p4022_p10, 1, 0 }
  0x21   : > { %p4026_p11 = pnand %p2940_p7, %p525_p9  ;;  %s3849_s21 = smov [#allocation10]  }
  0x22   : > { %5282 = sst [smem:[#allocation21_spill]] %s5281_s30  ;;  %s546_s1 = sshll.u32 %s3849_s21, 4  ;;  %s547_s1 = int_to_ptr.vmem [resolvable:$true] %s546_s1 }
  0x23   : > { %s5283_s0 = scalar_select %p4026_p11, 1, 0 }
  0x24   : > { %p3518_p12 = pneg %p4026_p11  ;;  %s3850_s23 = smov [#allocation11]  }
  0x25   : > { %s574_s26 = sshll.u32 %s3850_s23, 4  ;;  %s5285_s10 = sld [smem:[#allocation29_spill]]  ;;  %s4038_s26 = int_to_ptr.vmem [resolvable:$true] %s574_s26 }
  0x26   : > { %p4034_p13 = pnand %p3518_p12, %p5253_p5 }
  0x28   : > { %p3667_p1 = pneg %p4034_p13 }
  0x2b   : > { %s3665_s3 = scalar_lea.hbm %s5285_s10, 2048 }
  0x2c   : > { %p3666_p0 = scmp.ne.s32.totalorder %s5285_s10, %s3665_s3  ;;  %p3672_p6 = scmp.lt.u32.totalorder %s3665_s3, %s5285_s10 }
  0x2e   : > { %p3668_p2 = pnand %p3667_p1, %p3666_p0 }
  0x30   : > { %p3669_p3 = pneg %p3668_p2 }
  0x32   : > { %p3674_p7 = pnand %p3672_p6, %p3669_p3 }
  0x34   : > { %3677 = shalt.err (!%p3674_p7)
}
  0x35   : > { %s3678_s23 = scalar_lea.vmem %s547_s1, 2048  ;;  %p3686_p10 = scmp.lt.s32.totalorder %s547_s1, %s547_s1 }
  0x36   : > { %p3679_p9 = scmp.ne.s32.totalorder %s547_s1, %s3678_s23  ;;  %p3687_p8 = scmp.lt.s32.totalorder %s3678_s23, %s3678_s23 }
  0x38   : > { %p3681_p12 = pnand %p3679_p9, %p3667_p1  ;;  %p3688_p11 = por %p3687_p8, %p3686_p10 }
  0x3a   : > { %p3682_p5 = pneg %p3681_p12 }
  0x3c   : > { %p3689_p4 = pnand %p3688_p11, %p3682_p5 }
  0x3e   : > { %3692 = shalt.err (!%p3689_p4)
}
  0x3f   : > { %s3851_s20 = smov 128   ;;  %s3852_s28 = smov 8  }
  0x40   : > { %3521 = dma.hbm_to_vmem [thread:$0]  (!%p4034_p13), %s5285_s10, 2048, %s547_s1, [#allocation8], %s3851_s20, %s3851_s20, %s3852_s28  }
  0x41   : > { %s5286_s16 = sld [smem:[#allocation33_spill]] }
  0x47   : > { %s3693_s21 = scalar_lea.hbm %s5286_s16, 4096 }
  0x48   : > { %p3694_p0 = scmp.ne.s32.totalorder %s5286_s16, %s3693_s21  ;;  %p3700_p8 = scmp.lt.u32.totalorder %s3693_s21, %s5286_s16 }
  0x4a   : > { %p3696_p4 = pnand %p3694_p0, %p3667_p1 }
  0x4c   : > { %p3697_p5 = pneg %p3696_p4 }
  0x4e   : > { %p3702_p10 = pnand %p3700_p8, %p3697_p5 }
  0x50   : > { %3705 = shalt.err (!%p3702_p10)
}
  0x51   : > { %s3706_s1 = scalar_lea.vmem %s4038_s26, 4096  ;;  %p3714_p6 = scmp.lt.s32.totalorder %s4038_s26, %s4038_s26 }
  0x52   : > { %p3707_p11 = scmp.ne.s32.totalorder %s4038_s26, %s3706_s1  ;;  %p3715_p7 = scmp.lt.s32.totalorder %s3706_s1, %s3706_s1 }
  0x54   : > { %p3709_p2 = pnand %p3707_p11, %p3667_p1  ;;  %p3716_p9 = por %p3715_p7, %p3714_p6 }
  0x56   : > { %p3710_p3 = pneg %p3709_p2 }
  0x58   : > { %p3717_p12 = pnand %p3716_p9, %p3710_p3 }
  0x5a   : > { %3720 = shalt.err (!%p3717_p12)
}
  0x5b   : > { %s3853_s7 = smov 256   ;;  %s3854_s8 = smov 16  }
  0x5c   : > { %3524 = dma.hbm_to_vmem [thread:$0]  (!%p4034_p13), %s5286_s16, 4096, %s4038_s26, [#allocation12], %s3853_s7, %s3853_s7, %s3854_s8  }
  0x5d   : > { %p2943_p0 = scmp.ge.s32.totalorder %s3835_s25, 2 }
  0x5e   : > { %s4089_s28 = sand.u32 (!%p2943_p0), 1, %s3831_s2   ;;  %s2945_s14 = sshll.u32 (!%p2943_p0), %s3835_s25, 7 }
  0x5f   : > { %593 = sbr.rel (%p2943_p0) target bundleno = 167 (0xa7), region = 68  ;;  %s5260_s3 = sshll.u32 (!%p2943_p0), %s4089_s28, 6 }
  0x60   : > { %s5287_s27 = sld [smem:[#allocation22_spill]] (!%p2943_p0)  ;;  %s601_s26 = scalar_lea.vmem (!%p2943_p0), [#allocation5], %s5260_s3 }
  0x61   : > { %s607_s23 = sshll.u32 (!%p2943_p0), %s601_s26, 4  ;;  %s598_s7 = scalar_lea.sflag (!%p2943_p0), [#allocation6], %s4089_s28  ;;  %s4100_s23 = int_to_ptr.vmem [resolvable:$true] %s607_s23 }
  0x62   : > { %p5288_p1 = scmp.ne.s32.totalorder (!%p2943_p0), %s5279_s4, 0 }
  0x66   : > { %s4096_s21 = scalar_lea.hbm %s5287_s27, %s2945_s14  ;;  %s3725_s14 = scalar_lea.hbm %s5287_s27, 2048 }
  0x67   : > { %s3721_s8 = scalar_lea.hbm %s4096_s21, 1024  ;;  %p3726_p8 = scmp.lt.u32.totalorder %s4096_s21, %s5287_s27 }
  0x68   : > { %p3722_p13 = scmp.ne.s32.totalorder %s4096_s21, %s3721_s8  ;;  %p3727_p10 = scmp.lt.u32.totalorder %s3725_s14, %s3721_s8 }
  0x69   : > { %p3729_p2 = scmp.lt.u32.totalorder %s3721_s8, %s4096_s21 }
  0x6a   : > { %p3723_p4 = pnand %p3722_p13, %p5288_p1  ;;  %p3728_p11 = por %p3727_p10, %p3726_p8 }
  0x6c   : > { %p3724_p5 = pneg %p3723_p4  ;;  %p3730_p3 = por %p3729_p2, %p3728_p11 }
  0x6e   : > { %p3731_p6 = pnand %p3730_p3, %p3724_p5 }
  0x70   : > { %3734 = shalt.err (!%p3731_p6)
}
  0x71   : > { %s3735_s26 = scalar_lea.vmem %s4100_s23, 1024  ;;  %s3855_s13 = smov [#allocation5]  }
  0x72   : > { %p3736_p7 = scmp.ne.s32.totalorder %s4100_s23, %s3735_s26  ;;  %s3739_s20 = sshll.u32 %s3855_s13, 4  ;;  %s3740_s20 = int_to_ptr.vmem [resolvable:$false] %s3739_s20 }
  0x73   : > { %s3741_s30 = scalar_lea.vmem %s3740_s20, 2048  ;;  %p3742_p0 = scmp.lt.s32.totalorder %s4100_s23, %s3740_s20 }
  0x74   : > { %p3737_p9 = pnand %p3736_p7, %p5288_p1  ;;  %p3743_p13 = scmp.lt.s32.totalorder %s3741_s30, %s3735_s26 }
  0x76   : > { %p3738_p12 = pneg %p3737_p9  ;;  %p3744_p4 = por %p3743_p13, %p3742_p0 }
  0x78   : > { %p3745_p8 = pnand %p3744_p4, %p3738_p12 }
  0x7a   : > { %3748 = shalt.err (!%p3745_p8)
}
  0x7b   : > { %s3856_s8 = smov 256   ;;  %s3857_s14 = smov 128  }
  0x7c   : > { %s3858_s22 = smov 8   ;;  %s2946_s26 = sshll.u32 %s4089_s28, 7 }
  0x7d   : > { %3510 = dma.hbm_to_vmem [thread:$0]  (%p5288_p1), %s4096_s21, 1024, %s4100_s23, %s598_s7, %s3856_s8, %s3857_s14, %s3858_s22  }
  0x7e   : > { %s2980_s13 = sshll.u32 %s3835_s25, 11  ;;  %s5289_s3 = sld [smem:[#allocation23_spill]] }
  0x7f   : > { %s621_s10 = scalar_lea.vmem [#allocation7], %s2946_s26  ;;  %s5290_s27 = sand.u32 1, %s3835_s25  }
  0x80   : > { %s629_s16 = sshll.u32 %s621_s10, 4  ;;  %s4140_s2 = scalar_lea.sflag [#allocation8], %s5290_s27  ;;  %s4136_s16 = int_to_ptr.vmem [resolvable:$true] %s629_s16 }
  0x84   : > { %s4134_s1 = scalar_lea.hbm %s5289_s3, %s2980_s13  ;;  %s3753_s7 = scalar_lea.hbm %s5289_s3, 4096 }
  0x85   : > { %s3749_s11 = scalar_lea.hbm %s4134_s1, 2048  ;;  %p3754_p2 = scmp.lt.u32.totalorder %s4134_s1, %s5289_s3 }
  0x86   : > { %p3750_p5 = scmp.ne.s32.totalorder %s4134_s1, %s3749_s11  ;;  %p3755_p3 = scmp.lt.u32.totalorder %s3753_s7, %s3749_s11 }
  0x87   : > { %p3757_p7 = scmp.lt.u32.totalorder %s3749_s11, %s4134_s1 }
  0x88   : > { %p3751_p10 = pnand %p3750_p5, %p5288_p1  ;;  %p3756_p6 = por %p3755_p3, %p3754_p2 }
  0x8a   : > { %p3752_p11 = pneg %p3751_p10  ;;  %p3758_p9 = por %p3757_p7, %p3756_p6 }
  0x8c   : > { %p3759_p12 = pnand %p3758_p9, %p3752_p11 }
  0x8e   : > { %3762 = shalt.err (!%p3759_p12)
}
  0x8f   : > { %s3763_s10 = scalar_lea.vmem %s4136_s16, 2048  ;;  %s3859_s27 = smov [#allocation7]  }
  0x90   : > { %p3764_p0 = scmp.ne.s32.totalorder %s4136_s16, %s3763_s10  ;;  %s3767_s26 = sshll.u32 %s3859_s27, 4  ;;  %s3768_s26 = int_to_ptr.vmem [resolvable:$false] %s3767_s26 }
  0x91   : > { %s3769_s20 = scalar_lea.vmem %s3768_s26, 4096  ;;  %p3770_p8 = scmp.lt.s32.totalorder %s4136_s16, %s3768_s26 }
  0x92   : > { %p3765_p13 = pnand %p3764_p0, %p5288_p1  ;;  %p3771_p5 = scmp.lt.s32.totalorder %s3769_s20, %s3763_s10 }
  0x94   : > { %p3766_p4 = pneg %p3765_p13  ;;  %p3772_p10 = por %p3771_p5, %p3770_p8 }
  0x96   : > { %p3773_p2 = pnand %p3772_p10, %p3766_p4 }
  0x98   : > { %3776 = shalt.err (!%p3773_p2)
}
  0x99   : > { %3511 = dma.hbm_to_vmem [thread:$0]  (%p5288_p1), %s4134_s1, 2048, %s4136_s16, %s4140_s2, %s3857_s14, %s3857_s14, %s3858_s22  }
  0x9a   : > { %652 = sbr.rel (!%p5288_p1) target bundleno = 167 (0xa7), region = 88  ;;  %s2951_s11 = sshll.u32 (%p5288_p1), %s3835_s25, 3 }
  0x9b   : > { %s5291_s23 = sld [smem:[#allocation26_spill]] (%p5288_p1)  ;;  %s5292_s8 = sshll.u32 (%p5288_p1), %s4089_s28, 6 }
  0x9c   : > { %s656_s13 = scalar_lea.vmem (%p5288_p1), [#allocation9], %s5292_s8 }
  0xa1   : > { %s658_s7 = scalar_lea.vmem %s5291_s23, %s2951_s11 }
  0xa2   : > { %v700_v1 = vld [vmem:[%s658_s7] sm:$0xff]  ;;  %v702_v2 = vld [vmem:[%s658_s7 + $0x10] sm:$0xff] }
  0xa3   : > { %v704_v3 = vld [vmem:[%s658_s7 + $0x20] sm:$0xff]  ;;  %701 = vst [vmem:[%s656_s13] sm:$0xff] %v700_v1  ;;  %703 = vst [vmem:[%s656_s13 + $0x8] sm:$0xff] %v702_v2  ;;  %v706_v4 = vld [vmem:[%s658_s7 + $0x30] sm:$0xff] }
  0xa4   : > { %705 = vst [vmem:[%s656_s13 + $0x10] sm:$0xff] %v704_v3  ;;  %v708_v5 = vld [vmem:[%s658_s7 + $0x40] sm:$0xff]  ;;  %v710_v6 = vld [vmem:[%s658_s7 + $0x50] sm:$0xff]  ;;  %707 = vst [vmem:[%s656_s13 + $0x18] sm:$0xff] %v706_v4 }
  0xa5   : > { %709 = vst [vmem:[%s656_s13 + $0x20] sm:$0xff] %v708_v5  ;;  %711 = vst [vmem:[%s656_s13 + $0x28] sm:$0xff] %v710_v6  ;;  %v712_v7 = vld [vmem:[%s658_s7 + $0x60] sm:$0xff]  ;;  %v714_v8 = vld [vmem:[%s658_s7 + $0x70] sm:$0xff] }
  0xa6   : > { %713 = vst [vmem:[%s656_s13 + $0x30] sm:$0xff] %v712_v7  ;;  %715 = vst [vmem:[%s656_s13 + $0x38] sm:$0xff] %v714_v8 }
  0xa7 PF: > { %p5293_p1 = scmp.ne.s32.totalorder %s5283_s0, 0 }
  0xa8   : > { %s4178_s16 = sand.u32 (!%p5293_p1), 1, %s3827_s24   ;;  %p5294_p11 = scmp.ne.s32.totalorder (!%p5293_p1), %s5280_s29, 0 }
  0xa9   : > { %738 = sbr.rel (%p5293_p1) target bundleno = 2441 (0x989), region = 134  ;;  %s2953_s2 = sshll.u32 (!%p5293_p1), %s4178_s16, 6 }
  0xaa   : > { %s741_s25 = scalar_lea.sflag (!%p5293_p1), [#allocation6], %s4178_s16  ;;  %s4182_s4 = scalar_lea.vmem (!%p5293_p1), [#allocation5], %s2953_s2 }
  0xb0   : > { %3806 = dma.done.wait (%p5294_p11), %s741_s25, 1024  }
  0xb1   : > { %3808 = vsyncadd (%p5294_p11), %s741_s25, 4294966272  ;;  %s749_s0 = sand.u32 1, %s3993_s18   ;;  %s2954_s28 = sshll.u32 %s4178_s16, 7 }
  0xb2   : > { %s750_s1 = scalar_lea.sflag [#allocation8], %s749_s0  ;;  %s4190_s14 = scalar_lea.vmem [#allocation7], %s2954_s28 }
  0xb3   : > { %3810 = dma.done.wait (%p5294_p11), %s750_s1, 2048  }
  0xb4   : > { %3812 = vsyncadd (%p5294_p11), %s750_s1, 4294965248  ;;  %s4196_s22 = scalar_lea.vmem [#allocation9], %s2953_s2  ;;  %p5295_p3 = scmp.eq.s32.totalorder %s3993_s18, 0 }
  0xb6   : > { %3814 = dma.done.wait (%p5295_p3), [#allocation8], 2048   ;;  %p5296_p6 = pmov %p5295_p3 }
  0xb7   : > { %p5297_p7 = pmov %p5295_p3 }
  0xb8   : > { %3816 = vsyncadd (%p5296_p6), [#allocation8], 4294965248 }
  0xb9   : > { %3818 = dma.done.wait (%p5297_p7), [#allocation12], 4096   ;;  %p5298_p9 = pmov %p5295_p3 }
  0xba   : > { %s3505_s10 = smul.u32 56, %s4178_s16  ;;  %v3860_v9 = vmov 0   ;;  %v4210_v10 = vld [vmem:[%s5238_s12] ss:$0 sm:$0xff]  ;;  %v893_v15 = vld [vmem:[#allocation10] sm:$0xff]  ;;  %v894_v16 = vld [vmem:[#allocation10 + $0x8] sm:$0xff] }
  0xbb   : > { %3820 = vsyncadd (%p5298_p9), [#allocation12], 4294963200  ;;  %3600 = vset.pattern.permute.xlu0 %v3860_v9  ;;  %v4215_v11 = vld [vmem:[%s5235_s9] sm:$0xf]  ;;  %v895_v17 = vld [vmem:[#allocation10 + $0x10] sm:$0xff]  ;;  %v3189_v19 = vpack.c.bf16 %v894_v16, %v893_v15  ;;  %p850_p12 = scmp.lt.s32.totalorder %s3993_s18, 1 }
  0xbc   : > { %v4220_v12 = vld [vmem:[%s5241_s15] ss:$0 sm:$0xff]  ;;  %v897_v21 = vld [vmem:[#allocation10 + $0x20] sm:$0xff]  ;;  %v898_v22 = vld [vmem:[#allocation10 + $0x28] sm:$0xff]  ;;  %s5299_s21 = sld [smem:[#allocation24_spill]]  ;;  %s5300_s2 = sld [smem:[#allocation25_spill]] }
  0xbd   : > { %v4225_v13 = vld [vmem:[%s5243_s17] sm:$0x3]  ;;  %3190 = vmatprep.subr.bf16.mxu0 %v3189_v19  ;;  %v1086_v24 = vld [vmem:[%s5245_s19 + $0x8] sm:$0xff]  ;;  %v1087_v26 = vld [vmem:[%s5245_s19 + $0x10] sm:$0xff]  ;;  %v3197_v28 = vpack.c.bf16 %v898_v22, %v897_v21  ;;  %s851_s11 = scalar_select %p850_p12, %s3993_s18, 1  ;;  %vm1206_vm1 = vcmask 7168  }
  0xbe   : > { %v4227_v14 = vld [vmem:[#allocation4] ss:$0 sm:$0xff]  ;;  %3192 = vmatpush3.bf16.msra.mxu0 %v3189_v19  ;;  %v1088_v27 = vld [vmem:[%s5245_s19 + $0x18] sm:$0xff]  ;;  %v1090_v33 = vld [vmem:[%s5245_s19 + $0x28] sm:$0xff]  ;;  %s4371_s0 = smov 0  }
  0xbf   : > { %v896_v18 = vld [vmem:[#allocation10 + $0x18] sm:$0xff]  ;;  %v3225_v29 = vpack.c.bf16 %v1088_v27, %v1087_v26  ;;  %v899_v31 = vld [vmem:[#allocation10 + $0x30] sm:$0xff]  ;;  %v877_v34 = vld [vmem:[%s4190_s14] sm:$0xff]  ;;  %s2958_s8 = sshll.u32 %s851_s11, 3 }
  0xc0   : > { %v3193_v20 = vpack.c.bf16 %v896_v18, %v895_v17  ;;  %v1085_v23 = vld [vmem:[%s5245_s19] sm:$0xff]  ;;  %v1091_v37 = vld [vmem:[%s5245_s19 + $0x30] sm:$0xff]  ;;  %v1092_v38 = vld [vmem:[%s5245_s19 + $0x38] sm:$0xff]  ;;  %3086 = vmatprep.mubr.f32.mxu0 %v877_v34  ;;  %s861_s29 = scalar_lea.vmem %s5231_s5, %s2958_s8  ;;  %s865_s20 = scalar_lea.vmem %s5232_s6, %s2958_s8 }
  0xc1   : > { %v3221_v25 = vpack.c.bf16 %v1086_v24, %v1085_v23  ;;  %v1089_v30 = vld [vmem:[%s5245_s19 + $0x20] sm:$0xff]  ;;  %v902_v40 = vld [vmem:[#allocation10 + $0x48] sm:$0xff]  ;;  %v3233_v41 = vpack.c.bf16 %v1092_v38, %v1091_v37  ;;  %v903_v46 = vld [vmem:[#allocation10 + $0x50] sm:$0xff] }
  0xc2   : > { %3194 = vmatprep.subr.bf16.mxu0 %v3193_v20  ;;  %v900_v32 = vld [vmem:[#allocation10 + $0x38] sm:$0xff]  ;;  %v3229_v35 = vpack.c.bf16 %v1090_v33, %v1089_v30  ;;  %v901_v39 = vld [vmem:[#allocation10 + $0x40] sm:$0xff]  ;;  %s853_s23 = scalar_lea.vmem %s5299_s21, %s2958_s8  ;;  %s857_s25 = scalar_lea.vmem %s5300_s2, %s2958_s8  ;;  %v1095_v51 = vld [vmem:[%s5245_s19 + $0x50] sm:$0xff]  ;;  %v870_v33 = vlaneseq }
  0xc3   : > { %3222 = vmatprep.subr.bf16.mxu1 %v3221_v25  ;;  %3196 = vmatpush3.bf16.msra.mxu0 %v3193_v20  ;;  %v3201_v36 = vpack.c.bf16 %v900_v32, %v899_v31  ;;  %v3205_v42 = vpack.c.bf16 %v902_v40, %v901_v39  ;;  %v1093_v43 = vld [vmem:[%s5245_s19 + $0x40] sm:$0xff]  ;;  %v1094_v44 = vld [vmem:[%s5245_s19 + $0x48] sm:$0xff]  ;;  %v1096_v52 = vld [vmem:[%s5245_s19 + $0x58] sm:$0xff]  ;;  %s5301_s2 = sld [smem:[#allocation30_spill]] }
  0xc4   : > { %3224 = vmatpush3.bf16.msra.mxu1 %v3221_v25  ;;  %3198 = vmatprep.subr.bf16.mxu0 %v3197_v28  ;;  %v1077_v45 = vld [vmem:[%s4182_s4] sm:$0xff]  ;;  %v904_v47 = vld [vmem:[#allocation10 + $0x58] sm:$0xff]  ;;  %v3237_v48 = vpack.c.bf16 %v1094_v44, %v1093_v43  ;;  %v906_v53 = vld [vmem:[#allocation10 + $0x68] sm:$0xff]  ;;  %v3241_v59 = vpack.c.bf16 %v1096_v52, %v1095_v51  ;;  %v4324_v34 = vand.u32 127, %v870_v33 }
  0xc5   : > { %3226 = vmatprep.subr.bf16.mxu1 %v3225_v29  ;;  %3142 = vmatprep.mubr.f32.mxu1 %v1077_v45  ;;  %v3209_v49 = vpack.c.bf16 %v904_v47, %v903_v46  ;;  %v905_v50 = vld [vmem:[#allocation10 + $0x60] sm:$0xff]  ;;  %v907_v63 = vld [vmem:[#allocation10 + $0x70] sm:$0xff]  ;;  %v908_v0 = vld [vmem:[#allocation10 + $0x78] sm:$0xff] }
  0xc6   : > { %v866_v54 = vld [vmem:[%s865_s20] sm:$0xff]  ;;  %v3213_v60 = vpack.c.bf16 %v906_v53, %v905_v50  ;;  %v1098_v62 = vld [vmem:[%s5245_s19 + $0x68] sm:$0xff]  ;;  %v3217_v2 = vpack.c.bf16 %v908_v0, %v907_v63  ;;  %v1099_v3 = vld [vmem:[%s5245_s19 + $0x70] sm:$0xff] }
  0xc7   : > { %3200 = vmatpush3.bf16.msra.mxu0 %v3197_v28  ;;  %v867_v55 = vld [vmem:[%s861_s29] sm:$0xff]  ;;  %873 = vperm.xlu0 %3600, %v866_v54   ;;  %v1100_v4 = vld [vmem:[%s5245_s19 + $0x78] sm:$0xff]  ;;  %v878_v6 = vld [vmem:[%s4190_s14 + $0x8] sm:$0xff] }
  0xc8   : > { %3228 = vmatpush3.bf16.msra.mxu1 %v3225_v29  ;;  %3202 = vmatprep.subr.bf16.mxu0 %v3201_v36  ;;  %v4283_v56 = vadd.s32 4294967295, %v867_v55  ;;  %v4285_v57 = vld [vmem:[%s857_s25] sm:$0xff]  ;;  %v3249_v5 = vpack.c.bf16 %v1100_v4, %v1099_v3  ;;  %v879_v7 = vld [vmem:[%s4190_s14 + $0x10] sm:$0xff]  ;;  %v1078_v8 = vld [vmem:[%s4182_s4 + $0x8] sm:$0xff]  ;;  %s4364_s25 = scalar_lea.vmem [#allocation13], %s3505_s10 }
  0xc9   : > { %3230 = vmatprep.subr.bf16.mxu1 %v3229_v35  ;;  %v4287_v58 = vld [vmem:[%s853_s23] sm:$0xff]   ;;  %v1079_v15 = vld [vmem:[%s4182_s4 + $0x10] sm:$0xff]  ;;  %v882_v18 = vld [vmem:[%s4190_s14 + $0x28] sm:$0xff] }
  0xca   : > { %v1097_v61 = vld [vmem:[%s5245_s19 + $0x60] sm:$0xff]  ;;  %v883_v20 = vld [vmem:[%s4190_s14 + $0x30] sm:$0xff]  ;;  %v1082_v21 = vld [vmem:[%s4182_s4 + $0x28] sm:$0xff] }
  0xcb   : > { %3204 = vmatpush3.bf16.msra.mxu0 %v3201_v36  ;;  %v3245_v1 = vpack.c.bf16 %v1098_v62, %v1097_v61  ;;  %v880_v9 = vld [vmem:[%s4190_s14 + $0x18] sm:$0xff]  ;;  %v881_v16 = vld [vmem:[%s4190_s14 + $0x20] sm:$0xff]  ;;  %v1083_v23 = vld [vmem:[%s4182_s4 + $0x30] sm:$0xff]  ;;  %v4329_v36 = vadd.s32 128, %v4324_v34 }
  0xcc   : > { %3232 = vmatpush3.bf16.msra.mxu1 %v3229_v35  ;;  %3206 = vmatprep.subr.bf16.mxu0 %v3205_v42  ;;  %v1080_v17 = vld [vmem:[%s4182_s4 + $0x18] sm:$0xff]  ;;  %v1081_v19 = vld [vmem:[%s4182_s4 + $0x20] sm:$0xff]  ;;  %v886_v26 = vld [vmem:[%s4190_s14 + $0x48] sm:$0xff] }
  0xcd   : > { %3234 = vmatprep.subr.bf16.mxu1 %v3233_v41  ;;  %v884_v22 = vld [vmem:[%s4190_s14 + $0x38] sm:$0xff]  ;;  %v885_v24 = vld [vmem:[%s4190_s14 + $0x40] sm:$0xff]  ;;  %v887_v27 = vld [vmem:[%s4190_s14 + $0x50] sm:$0xff] }
  0xce   : > { %v1084_v25 = vld [vmem:[%s4182_s4 + $0x38] sm:$0xff]  ;;  %v889_v29 = vld [vmem:[%s4190_s14 + $0x60] sm:$0xff]  ;;  %v890_v30 = vld [vmem:[%s4190_s14 + $0x68] sm:$0xff] }
  0xcf   : > { %3208 = vmatpush3.bf16.msra.mxu0 %v3205_v42  ;;  %v888_v28 = vld [vmem:[%s4190_s14 + $0x58] sm:$0xff]  ;;  %v891_v31 = vld [vmem:[%s4190_s14 + $0x70] sm:$0xff] }
  0xd0   : > { %3236 = vmatpush3.bf16.msra.mxu1 %v3233_v41  ;;  %3210 = vmatprep.subr.bf16.mxu0 %v3209_v49  ;;  %v892_v32 = vld [vmem:[%s4190_s14 + $0x78] sm:$0xff] }
  0xd1   : > { %3238 = vmatprep.subr.bf16.mxu1 %v3237_v48  ;;  %v4336_v37 = vld [vmem:[%s5301_s2] ss:$0 sm:$0xff] }
  0xd3   : > { %3212 = vmatpush3.bf16.msra.mxu0 %v3209_v49 }
  0xd4   : > { %3240 = vmatpush3.bf16.msra.mxu1 %v3237_v48  ;;  %3214 = vmatprep.subr.bf16.mxu0 %v3213_v60 }
  0xd5   : > { %3242 = vmatprep.subr.bf16.mxu1 %v3241_v59 }
  0xd7   : > { %3216 = vmatpush3.bf16.msra.mxu0 %v3213_v60 }
  0xd8   : > { %3244 = vmatpush3.bf16.msra.mxu1 %v3241_v59  ;;  %3218 = vmatprep.subr.bf16.mxu0 %v3217_v2 }
  0xd9   : > { %3246 = vmatprep.subr.bf16.mxu1 %v3245_v1 }
  0xdb   : > { %3220 = vmatpush3.bf16.msra.mxu0 %v3217_v2 }
  0xdc   : > { %3248 = vmatpush3.bf16.msra.mxu1 %v3245_v1 }
  0xdd   : > { %3250 = vmatprep.subr.bf16.mxu1 %v3249_v5 }
  0xde   : > { %3087 = vmatmul.mubr.f32.vlgmr.msra.gmra.mrb[0].mxu0 %v878_v6 }
  0xdf   : > { %3089 = vmatprep.mubr.f32.mxu0 %v879_v7 }
  0xe0   : > { %3252 = vmatpush3.bf16.msra.mxu1 %v3249_v5 }
  0xe2   : > { %3090 = vmatmul.mubr.f32.gmra.mrb[2].mxu0 %v880_v9 }
  0xe3   : > { %3143 = vmatmul.mubr.f32.vlgmr.msra.gmra.mrb[0].mxu1 %v1078_v8  ;;  %3092 = vmatprep.mubr.f32.mxu0 %v881_v16 }
  0xe4   : > { %3145 = vmatprep.mubr.f32.mxu1 %v1079_v15 }
  0xe6   : > { %3093 = vmatmul.mubr.f32.gmra.mrb[4].mxu0 %v882_v18 }
  0xe7   : > { %3146 = vmatmul.mubr.f32.gmra.mrb[2].mxu1 %v1080_v17  ;;  %3095 = vmatprep.mubr.f32.mxu0 %v883_v20 }
  0xe8   : > { %3148 = vmatprep.mubr.f32.mxu1 %v1081_v19 }
  0xea   : > { %3096 = vmatmul.mubr.f32.gmra.mrb[6].mxu0 %v884_v22  ;;  %v4366_v22 = vmov 0.0  }
  0xeb   : > { %3149 = vmatmul.mubr.f32.gmra.mrb[4].mxu1 %v1082_v21  ;;  %3098 = vmatprep.mubr.f32.mxu0 %v885_v24 }
  0xec   : > { %3151 = vmatprep.mubr.f32.mxu1 %v1083_v23 }
  0xee   : > { %3099 = vmatmul.mubr.f32.gmra.mrb[8].mxu0 %v886_v26 }
  0xef   : > { %3152 = vmatmul.mubr.f32.gmra.mrb[6].mxu1 %v1084_v25  ;;  %3101 = vmatprep.mubr.f32.mxu0 %v887_v27 }
  0xf2   : > { %3102 = vmatmul.mubr.f32.gmra.mrb[10].mxu0 %v888_v28 }
  0xf3   : > { %3104 = vmatprep.mubr.f32.mxu0 %v889_v29 }
  0xf6   : > { %3105 = vmatmul.mubr.f32.gmra.mrb[12].mxu0 %v890_v30 }
  0xf7   : > { %3107 = vmatprep.mubr.f32.mxu0 %v891_v31 }
  0xfa   : > { %3108 = vmatmul.mubr.f32.gmra.mrb[14].mxu0 %v892_v32 }
 0x146   : > { %v4326_v35 = vpop.permute.xlu0 %873 }
 0x147   : > { %vm875_vm0 = vcmp.lt.s32.totalorder %v4324_v34, %v4326_v35 }
 0x1b1   : > { %v3088_v38 = vpop.f32.mrb[0].mxu0 }
 0x1b2   : > { %v988_v39 = vadd.f32 %v3088_v38, %v4336_v37  ;;  %v982_v40 = vpop.f32.mrb[1].mxu0 }
 0x1b3   : > { %v983_v41 = vadd.f32 %v4336_v37, %v982_v40 }
 0x1b4   : > { %1062 = vst [vmem:[#allocation2 + $0x8] sm:$0xff] %v988_v39 }
 0x1b5   : > { %1061 = vst [vmem:[#allocation2] sm:$0xff] %v983_v41  ;;  %v3091_v43 = vpop.f32.mrb[2].mxu0 }
 0x1b6   : > { %v3144_v42 = vpop.f32.mrb[0].mxu1  ;;  %v998_v45 = vadd.f32 %v3091_v43, %v4336_v37  ;;  %v992_v46 = vpop.f32.mrb[3].mxu0 }
 0x1b7   : > { %1208 = vst.msk [vmem:[#allocation3 + $0x8] sm:$0xff] %vm1206_vm1, %v3144_v42  ;;  %v1167_v44 = vpop.f32.mrb[1].mxu1  ;;  %v993_v47 = vadd.f32 %v4336_v37, %v992_v46 }
 0x1b8   : > { %1207 = vst.msk [vmem:[#allocation3] sm:$0xff] %vm1206_vm1, %v1167_v44  ;;  %1064 = vst [vmem:[#allocation2 + $0x18] sm:$0xff] %v998_v45 }
 0x1b9   : > { %1063 = vst [vmem:[#allocation2 + $0x10] sm:$0xff] %v993_v47  ;;  %v3094_v49 = vpop.f32.mrb[4].mxu0 }
 0x1ba   : > { %v3147_v48 = vpop.f32.mrb[2].mxu1  ;;  %v1008_v51 = vadd.f32 %v3094_v49, %v4336_v37  ;;  %v1002_v52 = vpop.f32.mrb[5].mxu0 }
 0x1bb   : > { %1210 = vst.msk [vmem:[#allocation3 + $0x18] sm:$0xff] %vm1206_vm1, %v3147_v48  ;;  %v1177_v50 = vpop.f32.mrb[3].mxu1  ;;  %v1003_v53 = vadd.f32 %v4336_v37, %v1002_v52 }
 0x1bc   : > { %1209 = vst.msk [vmem:[#allocation3 + $0x10] sm:$0xff] %vm1206_vm1, %v1177_v50  ;;  %1066 = vst [vmem:[#allocation2 + $0x28] sm:$0xff] %v1008_v51 }
 0x1bd   : > { %1065 = vst [vmem:[#allocation2 + $0x20] sm:$0xff] %v1003_v53  ;;  %v3097_v55 = vpop.f32.mrb[6].mxu0 }
 0x1be   : > { %v3150_v54 = vpop.f32.mrb[4].mxu1  ;;  %v1018_v60 = vadd.f32 %v3097_v55, %v4336_v37  ;;  %v1012_v61 = vpop.f32.mrb[7].mxu0 }
 0x1bf   : > { %1212 = vst.msk [vmem:[#allocation3 + $0x28] sm:$0xff] %vm1206_vm1, %v3150_v54  ;;  %v1187_v59 = vpop.f32.mrb[5].mxu1  ;;  %v1013_v62 = vadd.f32 %v4336_v37, %v1012_v61 }
 0x1c0   : > { %1211 = vst.msk [vmem:[#allocation3 + $0x20] sm:$0xff] %vm1206_vm1, %v1187_v59  ;;  %1068 = vst [vmem:[#allocation2 + $0x38] sm:$0xff] %v1018_v60 }
 0x1c1   : > { %1067 = vst [vmem:[#allocation2 + $0x30] sm:$0xff] %v1013_v62  ;;  %v3100_v0 = vpop.f32.mrb[8].mxu0 }
 0x1c2   : > { %v3153_v63 = vpop.f32.mrb[6].mxu1  ;;  %v1028_v2 = vadd.f32 %v3100_v0, %v4336_v37  ;;  %v1022_v3 = vpop.f32.mrb[9].mxu0 }
 0x1c3   : > { %1214 = vst.msk [vmem:[#allocation3 + $0x38] sm:$0xff] %vm1206_vm1, %v3153_v63  ;;  %v1197_v1 = vpop.f32.mrb[7].mxu1  ;;  %v1023_v4 = vadd.f32 %v4336_v37, %v1022_v3 }
 0x1c4   : > { %1213 = vst.msk [vmem:[#allocation3 + $0x30] sm:$0xff] %vm1206_vm1, %v1197_v1  ;;  %1070 = vst [vmem:[#allocation2 + $0x48] sm:$0xff] %v1028_v2 }
 0x1c5   : > { %1069 = vst [vmem:[#allocation2 + $0x40] sm:$0xff] %v1023_v4  ;;  %v3103_v5 = vpop.f32.mrb[10].mxu0 }
 0x1c6   : > { %v1038_v6 = vadd.f32 %v3103_v5, %v4336_v37  ;;  %v1032_v7 = vpop.f32.mrb[11].mxu0 }
 0x1c7   : > { %v1033_v8 = vadd.f32 %v4336_v37, %v1032_v7 }
 0x1c8   : > { %1072 = vst [vmem:[#allocation2 + $0x58] sm:$0xff] %v1038_v6 }
 0x1c9   : > { %1071 = vst [vmem:[#allocation2 + $0x50] sm:$0xff] %v1033_v8  ;;  %v3106_v9 = vpop.f32.mrb[12].mxu0 }
 0x1ca   : > { %v1048_v15 = vadd.f32 %v3106_v9, %v4336_v37  ;;  %v1042_v16 = vpop.f32.mrb[13].mxu0 }
 0x1cb   : > { %v1043_v17 = vadd.f32 %v4336_v37, %v1042_v16 }
 0x1cc   : > { %1074 = vst [vmem:[#allocation2 + $0x68] sm:$0xff] %v1048_v15 }
 0x1cd   : > { %1073 = vst [vmem:[#allocation2 + $0x60] sm:$0xff] %v1043_v17  ;;  %v3109_v18 = vpop.f32.mrb[14].mxu0 }
 0x1ce   : > { %v1058_v19 = vadd.f32 %v3109_v18, %v4336_v37  ;;  %v1052_v20 = vpop.f32.mrb[15].mxu0 }
 0x1cf   : > { %v1053_v21 = vadd.f32 %v4336_v37, %v1052_v20 }
 0x1d0   : > { %1076 = vst [vmem:[#allocation2 + $0x78] sm:$0xff] %v1058_v19 }
 0x1d1   : > { %1075 = vst [vmem:[#allocation2 + $0x70] sm:$0xff] %v1053_v21 }
 0x1d2 LB: >> { %s5302_s28 = sld [smem:[#allocation28_spill]]  ;;  %v3861_v30 = vmov 0.0   ;;  %s5303_s21 = sld [smem:[#allocation27_spill]]  ;;  %vm3863_vm2 = vmmov 0   ;;  %vm2107_vm3 = vcmask 130112   ;;  %vm2172_vm4 = vcmask 1041409   ;;  %s3847_s0 = sphi %s4371_s0, %s1226_s0   ;;  %v3843_v58 = vphi %v4287_v58, %v2679_v58   ;;  %v3839_v22 = vphi %v4366_v22, %v2680_v22  }
 0x1d3   : >> { %1432 = vmatprep.mubr.f32.mxu0 %v3861_v30  ;;  %1503 = vmatprep.mubr.f32.mxu1 %v3861_v30  ;;  %s4773_s23 = sshll.u32 %s3847_s0, 3  ;;  %s5304_s16 = sld [smem:[#allocation31_spill]]  ;;  %vm2174_vm5 = vcmask 1042434   ;;  %vm2176_vm6 = vcmask 1043459   ;;  %vm2178_vm7 = vcmask 1044484   ;;  %vm2180_vm8 = vcmask 1045509  }
 0x1d4   : >> { %s1232_s7 = scalar_lea.vmem %s4182_s4, %s4773_s23 [#allocation5]  ;;  %vm2182_vm9 = vcmask 1046534   ;;  %vm2184_vm10 = vcmask 1047559   ;;  %vm2188_vm11 = vcmask 130048   ;;  %s5305_s10 = sld [smem:[#allocation32_spill]] }
 0x1d5   : >> { %s1234_s20 = scalar_lea.vmem %s4196_s22, %s4773_s23 [#allocation9]  ;;  %s2672_s2 = scalar_lea.vmem %s4364_s25, %s4773_s23 [#allocation13] }
 0x1d8   : >> { %v1305_v23 = vld [vmem:[%s5302_s28 + $0x8] sm:$0xff]  ;;  %v1307_v25 = vld [vmem:[%s5302_s28 + $0x18] sm:$0xff]  ;;  %v1304_v28 = vld [vmem:[%s5302_s28] sm:$0xff] }
 0x1d9   : >> { %v1309_v24 = vld [vmem:[%s5302_s28 + $0x28] sm:$0xff]  ;;  %v1311_v27 = vld [vmem:[%s5302_s28 + $0x38] sm:$0xff]  ;;  %v1308_v29 = vld [vmem:[%s5302_s28 + $0x20] sm:$0xff] }
 0x1da   : >> { %v3253_v26 = vpack.c.bf16 %v1309_v24, %v1305_v23  ;;  %v3285_v31 = vpack.c.bf16 %v1311_v27, %v1307_v25  ;;  %v3255_v32 = vpack.c.bf16 %v1308_v29, %v1304_v28  ;;  %v1306_v37 = vld [vmem:[%s5302_s28 + $0x10] sm:$0xff]  ;;  %v1313_v39 = vld [vmem:[%s5302_s28 + $0x48] sm:$0xff]  ;;  %v1315_v42 = vld [vmem:[%s5302_s28 + $0x58] sm:$0xff] }
 0x1db   : >> { %v1310_v38 = vld [vmem:[%s5302_s28 + $0x30] sm:$0xff]  ;;  %v1317_v41 = vld [vmem:[%s5302_s28 + $0x68] sm:$0xff]  ;;  %v1319_v43 = vld [vmem:[%s5302_s28 + $0x78] sm:$0xff] }
 0x1dc   : >> { %3254 = vmatprep.subr.bf16.mxu0 %v3253_v26  ;;  %v3287_v40 = vpack.c.bf16 %v1310_v38, %v1306_v37  ;;  %3286 = vmatprep.subr.bf16.mxu1 %v3285_v31  ;;  %v3257_v44 = vpack.c.bf16 %v1317_v41, %v1313_v39  ;;  %v3289_v45 = vpack.c.bf16 %v1319_v43, %v1315_v42  ;;  %v1312_v46 = vld [vmem:[%s5302_s28 + $0x40] sm:$0xff]  ;;  %v1314_v48 = vld [vmem:[%s5302_s28 + $0x50] sm:$0xff]  ;;  %v1321_v51 = vld [vmem:[%s5302_s28 + $0x88] sm:$0xff] }
 0x1dd   : >> { %3256 = vmatpush1.bf16.msra.mxu0 %v3255_v32  ;;  %v1316_v47 = vld [vmem:[%s5302_s28 + $0x60] sm:$0xff]  ;;  %v1318_v50 = vld [vmem:[%s5302_s28 + $0x70] sm:$0xff]  ;;  %v1325_v52 = vld [vmem:[%s5302_s28 + $0xa8] sm:$0xff] }
 0x1de   : >> { %3288 = vmatpush1.bf16.msra.mxu1 %v3287_v40  ;;  %v3259_v49 = vpack.c.bf16 %v1316_v47, %v1312_v46  ;;  %3258 = vmatprep.subr.bf16.mxu0 %v3257_v44  ;;  %v3291_v53 = vpack.c.bf16 %v1318_v50, %v1314_v48  ;;  %v3261_v54 = vpack.c.bf16 %v1325_v52, %v1321_v51  ;;  %v1323_v55 = vld [vmem:[%s5302_s28 + $0x98] sm:$0xff]  ;;  %v1320_v60 = vld [vmem:[%s5302_s28 + $0x80] sm:$0xff]  ;;  %v1322_v63 = vld [vmem:[%s5302_s28 + $0x90] sm:$0xff] }
 0x1df   : >> { %3290 = vmatprep.subr.bf16.mxu1 %v3289_v45  ;;  %v1327_v59 = vld [vmem:[%s5302_s28 + $0xb8] sm:$0xff]  ;;  %v1324_v62 = vld [vmem:[%s5302_s28 + $0xa0] sm:$0xff]  ;;  %v1326_v0 = vld [vmem:[%s5302_s28 + $0xb0] sm:$0xff] }
 0x1e0   : >> { %v3293_v61 = vpack.c.bf16 %v1327_v59, %v1323_v55  ;;  %v3263_v1 = vpack.c.bf16 %v1324_v62, %v1320_v60  ;;  %v1329_v2 = vld [vmem:[%s5302_s28 + $0xc8] sm:$0xff]  ;;  %v1331_v4 = vld [vmem:[%s5302_s28 + $0xd8] sm:$0xff]  ;;  %v3295_v5 = vpack.c.bf16 %v1326_v0, %v1322_v63  ;;  %v1328_v8 = vld [vmem:[%s5302_s28 + $0xc0] sm:$0xff] }
 0x1e1   : >> { %3260 = vmatpush1.bf16.msra.mxu0 %v3259_v49  ;;  %v1333_v3 = vld [vmem:[%s5302_s28 + $0xe8] sm:$0xff]  ;;  %v1335_v7 = vld [vmem:[%s5302_s28 + $0xf8] sm:$0xff]  ;;  %v1332_v9 = vld [vmem:[%s5302_s28 + $0xe0] sm:$0xff] }
 0x1e2   : >> { %3292 = vmatpush1.bf16.msra.mxu1 %v3291_v53  ;;  %3262 = vmatprep.subr.bf16.mxu0 %v3261_v54  ;;  %v3265_v6 = vpack.c.bf16 %v1333_v3, %v1329_v2  ;;  %v3297_v15 = vpack.c.bf16 %v1335_v7, %v1331_v4  ;;  %v1330_v16 = vld [vmem:[%s5302_s28 + $0xd0] sm:$0xff]  ;;  %v1337_v18 = vld [vmem:[%s5302_s28 + $0x108] sm:$0xff]  ;;  %v1339_v20 = vld [vmem:[%s5302_s28 + $0x118] sm:$0xff]  ;;  %v3267_v23 = vpack.c.bf16 %v1332_v9, %v1328_v8 }
 0x1e3   : >> { %3294 = vmatprep.subr.bf16.mxu1 %v3293_v61  ;;  %v1334_v17 = vld [vmem:[%s5302_s28 + $0xf0] sm:$0xff]  ;;  %v1341_v19 = vld [vmem:[%s5302_s28 + $0x128] sm:$0xff]  ;;  %v1343_v21 = vld [vmem:[%s5302_s28 + $0x138] sm:$0xff] }
 0x1e4   : >> { %v3299_v24 = vpack.c.bf16 %v1334_v17, %v1330_v16  ;;  %v3269_v25 = vpack.c.bf16 %v1341_v19, %v1337_v18  ;;  %v1336_v26 = vld [vmem:[%s5302_s28 + $0x100] sm:$0xff]  ;;  %v1338_v28 = vld [vmem:[%s5302_s28 + $0x110] sm:$0xff]  ;;  %v3301_v29 = vpack.c.bf16 %v1343_v21, %v1339_v20  ;;  %v1345_v32 = vld [vmem:[%s5302_s28 + $0x148] sm:$0xff] }
 0x1e5   : >> { %3264 = vmatpush1.bf16.msra.mxu0 %v3263_v1  ;;  %v1340_v27 = vld [vmem:[%s5302_s28 + $0x120] sm:$0xff]  ;;  %v1342_v31 = vld [vmem:[%s5302_s28 + $0x130] sm:$0xff]  ;;  %v1349_v37 = vld [vmem:[%s5302_s28 + $0x168] sm:$0xff] }
 0x1e6   : >> { %3296 = vmatpush1.bf16.msra.mxu1 %v3295_v5  ;;  %3266 = vmatprep.subr.bf16.mxu0 %v3265_v6  ;;  %v1347_v38 = vld [vmem:[%s5302_s28 + $0x158] sm:$0xff]  ;;  %v3271_v40 = vpack.c.bf16 %v1340_v27, %v1336_v26  ;;  %v3303_v41 = vpack.c.bf16 %v1342_v31, %v1338_v28  ;;  %v3273_v42 = vpack.c.bf16 %v1349_v37, %v1345_v32  ;;  %v1344_v43 = vld [vmem:[%s5302_s28 + $0x140] sm:$0xff]  ;;  %v1346_v45 = vld [vmem:[%s5302_s28 + $0x150] sm:$0xff] }
 0x1e7   : >> { %3298 = vmatprep.subr.bf16.mxu1 %v3297_v15  ;;  %v1351_v39 = vld [vmem:[%s5302_s28 + $0x178] sm:$0xff]  ;;  %v1348_v44 = vld [vmem:[%s5302_s28 + $0x160] sm:$0xff]  ;;  %v1350_v47 = vld [vmem:[%s5302_s28 + $0x170] sm:$0xff] }
 0x1e8   : >> { %v3305_v46 = vpack.c.bf16 %v1351_v39, %v1347_v38  ;;  %v1353_v48 = vld [vmem:[%s5302_s28 + $0x188] sm:$0xff]  ;;  %v1355_v50 = vld [vmem:[%s5302_s28 + $0x198] sm:$0xff]  ;;  %v3275_v52 = vpack.c.bf16 %v1348_v44, %v1344_v43  ;;  %v3307_v53 = vpack.c.bf16 %v1350_v47, %v1346_v45  ;;  %v1352_v55 = vld [vmem:[%s5302_s28 + $0x180] sm:$0xff] }
 0x1e9   : >> { %3268 = vmatpush1.bf16.msra.mxu0 %v3267_v23  ;;  %v1357_v49 = vld [vmem:[%s5302_s28 + $0x1a8] sm:$0xff]  ;;  %v1359_v51 = vld [vmem:[%s5302_s28 + $0x1b8] sm:$0xff]  ;;  %v1356_v59 = vld [vmem:[%s5302_s28 + $0x1a0] sm:$0xff] }
 0x1ea   : >> { %3300 = vmatpush1.bf16.msra.mxu1 %v3299_v24  ;;  %3270 = vmatprep.subr.bf16.mxu0 %v3269_v25  ;;  %v3277_v54 = vpack.c.bf16 %v1357_v49, %v1353_v48  ;;  %v1354_v60 = vld [vmem:[%s5302_s28 + $0x190] sm:$0xff]  ;;  %v3309_v61 = vpack.c.bf16 %v1359_v51, %v1355_v50  ;;  %v1361_v63 = vld [vmem:[%s5302_s28 + $0x1c8] sm:$0xff]  ;;  %v1363_v1 = vld [vmem:[%s5302_s28 + $0x1d8] sm:$0xff]  ;;  %v3279_v3 = vpack.c.bf16 %v1356_v59, %v1352_v55 }
 0x1eb   : >> { %3302 = vmatprep.subr.bf16.mxu1 %v3301_v29  ;;  %v1358_v62 = vld [vmem:[%s5302_s28 + $0x1b0] sm:$0xff]  ;;  %v1365_v0 = vld [vmem:[%s5302_s28 + $0x1e8] sm:$0xff]  ;;  %v1367_v2 = vld [vmem:[%s5302_s28 + $0x1f8] sm:$0xff] }
 0x1ec   : >> { %v3311_v4 = vpack.c.bf16 %v1358_v62, %v1354_v60  ;;  %v3281_v5 = vpack.c.bf16 %v1365_v0, %v1361_v63  ;;  %v1360_v6 = vld [vmem:[%s5302_s28 + $0x1c0] sm:$0xff]  ;;  %v1362_v8 = vld [vmem:[%s5302_s28 + $0x1d0] sm:$0xff]  ;;  %v3313_v9 = vpack.c.bf16 %v1367_v2, %v1363_v1  ;;  %v1241_v16 = vld [vmem:[%s5303_s21 + $0x8] sm:$0xff] }
 0x1ed   : >> { %3272 = vmatpush1.bf16.msra.mxu0 %v3271_v40  ;;  %v1364_v7 = vld [vmem:[%s5302_s28 + $0x1e0] sm:$0xff]  ;;  %v1366_v15 = vld [vmem:[%s5302_s28 + $0x1f0] sm:$0xff]  ;;  %v1245_v17 = vld [vmem:[%s5303_s21 + $0x28] sm:$0xff] }
 0x1ee   : >> { %3304 = vmatpush1.bf16.msra.mxu1 %v3303_v41  ;;  %3274 = vmatprep.subr.bf16.mxu0 %v3273_v42  ;;  %v1243_v18 = vld [vmem:[%s5303_s21 + $0x18] sm:$0xff]  ;;  %v3283_v20 = vpack.c.bf16 %v1364_v7, %v1360_v6  ;;  %v3315_v21 = vpack.c.bf16 %v1366_v15, %v1362_v8  ;;  %v3317_v23 = vpack.c.bf16 %v1245_v17, %v1241_v16  ;;  %v1240_v24 = vld [vmem:[%s5303_s21] sm:$0xff]  ;;  %v1242_v26 = vld [vmem:[%s5303_s21 + $0x10] sm:$0xff] }
 0x1ef   : >> { %3306 = vmatprep.subr.bf16.mxu1 %v3305_v46  ;;  %v1247_v19 = vld [vmem:[%s5303_s21 + $0x38] sm:$0xff]  ;;  %v1244_v25 = vld [vmem:[%s5303_s21 + $0x20] sm:$0xff]  ;;  %v1246_v28 = vld [vmem:[%s5303_s21 + $0x30] sm:$0xff] }
 0x1f0   : >> { %v3349_v27 = vpack.c.bf16 %v1247_v19, %v1243_v18  ;;  %v1249_v29 = vld [vmem:[%s5303_s21 + $0x48] sm:$0xff]  ;;  %v1251_v32 = vld [vmem:[%s5303_s21 + $0x58] sm:$0xff]  ;;  %v3319_v38 = vpack.c.bf16 %v1244_v25, %v1240_v24  ;;  %v3351_v39 = vpack.c.bf16 %v1246_v28, %v1242_v26  ;;  %v1248_v41 = vld [vmem:[%s5303_s21 + $0x40] sm:$0xff] }
 0x1f1   : >> { %3276 = vmatpush1.bf16.msra.mxu0 %v3275_v52  ;;  %v1253_v31 = vld [vmem:[%s5303_s21 + $0x68] sm:$0xff]  ;;  %v1255_v37 = vld [vmem:[%s5303_s21 + $0x78] sm:$0xff]  ;;  %v1252_v42 = vld [vmem:[%s5303_s21 + $0x60] sm:$0xff] }
 0x1f2   : >> { %3308 = vmatpush1.bf16.msra.mxu1 %v3307_v53  ;;  %3278 = vmatprep.subr.bf16.mxu0 %v3277_v54  ;;  %v3321_v40 = vpack.c.bf16 %v1253_v31, %v1249_v29  ;;  %v1250_v43 = vld [vmem:[%s5303_s21 + $0x50] sm:$0xff]  ;;  %v3353_v44 = vpack.c.bf16 %v1255_v37, %v1251_v32  ;;  %v1257_v46 = vld [vmem:[%s5303_s21 + $0x88] sm:$0xff]  ;;  %v1259_v48 = vld [vmem:[%s5303_s21 + $0x98] sm:$0xff]  ;;  %v3323_v50 = vpack.c.bf16 %v1252_v42, %v1248_v41 }
 0x1f3   : >> { %3310 = vmatprep.subr.bf16.mxu1 %v3309_v61  ;;  %v1254_v45 = vld [vmem:[%s5303_s21 + $0x70] sm:$0xff]  ;;  %v1261_v47 = vld [vmem:[%s5303_s21 + $0xa8] sm:$0xff]  ;;  %v1263_v49 = vld [vmem:[%s5303_s21 + $0xb8] sm:$0xff] }
 0x1f4   : >> { %v3355_v51 = vpack.c.bf16 %v1254_v45, %v1250_v43  ;;  %v3325_v52 = vpack.c.bf16 %v1261_v47, %v1257_v46  ;;  %v1256_v53 = vld [vmem:[%s5303_s21 + $0x80] sm:$0xff]  ;;  %v1258_v55 = vld [vmem:[%s5303_s21 + $0x90] sm:$0xff]  ;;  %v3357_v59 = vpack.c.bf16 %v1263_v49, %v1259_v48  ;;  %v1265_v61 = vld [vmem:[%s5303_s21 + $0xc8] sm:$0xff] }
 0x1f5   : >> { %3280 = vmatpush1.bf16.msra.mxu0 %v3279_v3  ;;  %v1260_v54 = vld [vmem:[%s5303_s21 + $0xa0] sm:$0xff]  ;;  %v1262_v60 = vld [vmem:[%s5303_s21 + $0xb0] sm:$0xff]  ;;  %v1269_v62 = vld [vmem:[%s5303_s21 + $0xe8] sm:$0xff] }
 0x1f6   : >> { %3312 = vmatpush1.bf16.msra.mxu1 %v3311_v4  ;;  %3282 = vmatprep.subr.bf16.mxu0 %v3281_v5  ;;  %v1267_v63 = vld [vmem:[%s5303_s21 + $0xd8] sm:$0xff]  ;;  %v3327_v1 = vpack.c.bf16 %v1260_v54, %v1256_v53  ;;  %v3359_v2 = vpack.c.bf16 %v1262_v60, %v1258_v55  ;;  %v3329_v3 = vpack.c.bf16 %v1269_v62, %v1265_v61  ;;  %v1264_v4 = vld [vmem:[%s5303_s21 + $0xc0] sm:$0xff]  ;;  %v1266_v6 = vld [vmem:[%s5303_s21 + $0xd0] sm:$0xff] }
 0x1f7   : >> { %3314 = vmatprep.subr.bf16.mxu1 %v3313_v9  ;;  %v1271_v0 = vld [vmem:[%s5303_s21 + $0xf8] sm:$0xff]  ;;  %v1268_v5 = vld [vmem:[%s5303_s21 + $0xe0] sm:$0xff]  ;;  %v1270_v8 = vld [vmem:[%s5303_s21 + $0xf0] sm:$0xff] }
 0x1f8   : >> { %v3361_v7 = vpack.c.bf16 %v1271_v0, %v1267_v63  ;;  %v1273_v9 = vld [vmem:[%s5303_s21 + $0x108] sm:$0xff]  ;;  %v1275_v16 = vld [vmem:[%s5303_s21 + $0x118] sm:$0xff]  ;;  %v3331_v18 = vpack.c.bf16 %v1268_v5, %v1264_v4  ;;  %v3363_v19 = vpack.c.bf16 %v1270_v8, %v1266_v6  ;;  %v1274_v24 = vld [vmem:[%s5303_s21 + $0x110] sm:$0xff] }
 0x1f9   : >> { %3284 = vmatpush1.bf16.msra.mxu0 %v3283_v20  ;;  %v1277_v15 = vld [vmem:[%s5303_s21 + $0x128] sm:$0xff]  ;;  %v1279_v17 = vld [vmem:[%s5303_s21 + $0x138] sm:$0xff]  ;;  %v1278_v26 = vld [vmem:[%s5303_s21 + $0x130] sm:$0xff] }
 0x1fa   : >> { %3316 = vmatpush1.bf16.msra.mxu1 %v3315_v21  ;;  %3318 = vmatprep.subr.bf16.mxu0 %v3317_v23  ;;  %v3333_v20 = vpack.c.bf16 %v1277_v15, %v1273_v9  ;;  %v1272_v21 = vld [vmem:[%s5303_s21 + $0x100] sm:$0xff]  ;;  %v3365_v25 = vpack.c.bf16 %v1279_v17, %v1275_v16  ;;  %v1285_v28 = vld [vmem:[%s5303_s21 + $0x168] sm:$0xff]  ;;  %v1283_v29 = vld [vmem:[%s5303_s21 + $0x158] sm:$0xff]  ;;  %v3367_v37 = vpack.c.bf16 %v1278_v26, %v1274_v24  ;;  %v3862_v24 = vmov 0.0|0.0  }
 0x1fb   : >> { %3350 = vmatprep.subr.bf16.mxu1 %v3349_v27  ;;  %v1276_v23 = vld [vmem:[%s5303_s21 + $0x120] sm:$0xff]  ;;  %v1281_v27 = vld [vmem:[%s5303_s21 + $0x148] sm:$0xff]  ;;  %v1287_v31 = vld [vmem:[%s5303_s21 + $0x178] sm:$0xff] }
 0x1fc   : >> { %1433 = vmatmul.mubr.f32.vlgmr.msra.gmra.mrb[0].mxu0 %v3843_v58  ;;  %v3335_v32 = vpack.c.bf16 %v1276_v23, %v1272_v21  ;;  %v1282_v41 = vld [vmem:[%s5303_s21 + $0x150] sm:$0xff]  ;;  %v3369_v42 = vpack.c.bf16 %v1287_v31, %v1283_v29  ;;  %v1293_v45 = vld [vmem:[%s5303_s21 + $0x1a8] sm:$0xff]  ;;  %v1291_v46 = vld [vmem:[%s5303_s21 + $0x198] sm:$0xff] }
 0x1fd   : >> { %1504 = vmatmul.mubr.f32.vlgmr.msra.gmra.mrb[0].mxu1 %v3843_v58  ;;  %3320 = vmatpush1.bf16.msra.mxu0 %v3319_v38  ;;  %v3337_v38 = vpack.c.bf16 %v1285_v28, %v1281_v27  ;;  %v1286_v43 = vld [vmem:[%s5303_s21 + $0x170] sm:$0xff]  ;;  %v1295_v47 = vld [vmem:[%s5303_s21 + $0x1b8] sm:$0xff]  ;;  %v1301_v60 = vld [vmem:[%s5303_s21 + $0x1e8] sm:$0xff] }
 0x1fe   : >> { %3352 = vmatpush1.bf16.msra.mxu1 %v3351_v39  ;;  %3322 = vmatprep.subr.bf16.mxu0 %v3321_v40  ;;  %v1280_v39 = vld [vmem:[%s5303_s21 + $0x140] sm:$0xff]  ;;  %v3371_v49 = vpack.c.bf16 %v1286_v43, %v1282_v41  ;;  %v1290_v53 = vld [vmem:[%s5303_s21 + $0x190] sm:$0xff]  ;;  %v3373_v54 = vpack.c.bf16 %v1295_v47, %v1291_v46  ;;  %v1299_v61 = vld [vmem:[%s5303_s21 + $0x1d8] sm:$0xff] }
 0x1ff   : >> { %3354 = vmatprep.subr.bf16.mxu1 %v3353_v44  ;;  %1574 = vmatprep.mubr.f32.mxu0 %v3861_v30  ;;  %v1284_v40 = vld [vmem:[%s5303_s21 + $0x160] sm:$0xff]  ;;  %v1289_v44 = vld [vmem:[%s5303_s21 + $0x188] sm:$0xff]  ;;  %v1294_v55 = vld [vmem:[%s5303_s21 + $0x1b0] sm:$0xff] }
 0x200   : >> { %1645 = vmatprep.mubr.f32.mxu1 %v3861_v30  ;;  %v3339_v48 = vpack.c.bf16 %v1284_v40, %v1280_v39  ;;  %v1303_v62 = vld [vmem:[%s5303_s21 + $0x1f8] sm:$0xff]  ;;  %v3375_v0 = vpack.c.bf16 %v1294_v55, %v1290_v53  ;;  %v1298_v5 = vld [vmem:[%s5303_s21 + $0x1d0] sm:$0xff]  ;;  %v1233_v9 = vld [vmem:[%s1232_s7] sm:$0xff] }
 0x201   : >> { %3324 = vmatpush1.bf16.msra.mxu0 %v3323_v50  ;;  %v3341_v50 = vpack.c.bf16 %v1293_v45, %v1289_v44  ;;  %v3377_v4 = vpack.c.bf16 %v1303_v62, %v1299_v61  ;;  %v1302_v6 = vld [vmem:[%s5303_s21 + $0x1f0] sm:$0xff]  ;;  %v1702_v15 = vld [vmem:[%s5304_s16 + $0x8] sm:$0xff]  ;;  %v1705_v16 = vld [vmem:[%s5304_s16 + $0x20] sm:$0xff] }
 0x202   : >> { %3356 = vmatpush1.bf16.msra.mxu1 %v3355_v51  ;;  %3326 = vmatprep.subr.bf16.mxu0 %v3325_v52  ;;  %v1288_v51 = vld [vmem:[%s5303_s21 + $0x180] sm:$0xff]  ;;  %v3379_v8 = vpack.c.bf16 %v1302_v6, %v1298_v5  ;;  %v3381_v17 = vpack.c.bf16 %v1705_v16, %v1702_v15  ;;  %v1706_v23 = vld [vmem:[%s5304_s16 + $0x28] sm:$0xff]  ;;  %v1708_v26 = vld [vmem:[%s5304_s16 + $0x38] sm:$0xff] }
 0x203   : >> { %3358 = vmatprep.subr.bf16.mxu1 %v3357_v59  ;;  %v1292_v52 = vld [vmem:[%s5303_s21 + $0x1a0] sm:$0xff]  ;;  %v1297_v59 = vld [vmem:[%s5303_s21 + $0x1c8] sm:$0xff]  ;;  %v1711_v27 = vld [vmem:[%s5304_s16 + $0x50] sm:$0xff] }
 0x204   : >> { %v3343_v63 = vpack.c.bf16 %v1292_v52, %v1288_v51  ;;  %v3385_v28 = vpack.c.bf16 %v1711_v27, %v1708_v26  ;;  %v1707_v29 = vld [vmem:[%s5304_s16 + $0x30] sm:$0xff]  ;;  %v1710_v31 = vld [vmem:[%s5304_s16 + $0x48] sm:$0xff]  ;;  %v1717_v41 = vld [vmem:[%s5304_s16 + $0x80] sm:$0xff] }
 0x205   : >> { %3328 = vmatpush1.bf16.msra.mxu0 %v3327_v1  ;;  %v3345_v1 = vpack.c.bf16 %v1301_v60, %v1297_v59  ;;  %v1714_v40 = vld [vmem:[%s5304_s16 + $0x68] sm:$0xff]  ;;  %v1713_v43 = vld [vmem:[%s5304_s16 + $0x60] sm:$0xff]  ;;  %v1716_v44 = vld [vmem:[%s5304_s16 + $0x78] sm:$0xff] }
 0x206   : >> { %3360 = vmatpush1.bf16.msra.mxu1 %v3359_v2  ;;  %3330 = vmatprep.subr.bf16.mxu0 %v3329_v3  ;;  %v1296_v2 = vld [vmem:[%s5303_s21 + $0x1c0] sm:$0xff]  ;;  %v1715_v45 = vld [vmem:[%s5304_s16 + $0x70] sm:$0xff]  ;;  %v3391_v46 = vpack.c.bf16 %v1716_v44, %v1713_v43  ;;  %v1718_v47 = vld [vmem:[%s5304_s16 + $0x88] sm:$0xff] }
 0x207   : >> { %3362 = vmatprep.subr.bf16.mxu1 %v3361_v7  ;;  %v1300_v3 = vld [vmem:[%s5303_s21 + $0x1e0] sm:$0xff]  ;;  %v1719_v52 = vld [vmem:[%s5304_s16 + $0x90] sm:$0xff]  ;;  %v1722_v53 = vld [vmem:[%s5304_s16 + $0xa8] sm:$0xff] }
 0x208   : >> { %v3347_v7 = vpack.c.bf16 %v1300_v3, %v1296_v2  ;;  %v3395_v55 = vpack.c.bf16 %v1722_v53, %v1719_v52  ;;  %v1724_v59 = vld [vmem:[%s5304_s16 + $0xb8] sm:$0xff]  ;;  %v1726_v61 = vld [vmem:[%s5304_s16 + $0xc8] sm:$0xff]  ;;  %v1729_v62 = vld [vmem:[%s5304_s16 + $0xe0] sm:$0xff] }
 0x209   : >> { %3332 = vmatpush1.bf16.msra.mxu0 %v3331_v18  ;;  %v1701_v18 = vld [vmem:[%s5304_s16] sm:$0xff]  ;;  %v1727_v2 = vld [vmem:[%s5304_s16 + $0xd0] sm:$0xff]  ;;  %v1732_v6 = vld [vmem:[%s5304_s16 + $0xf8] sm:$0xff] }
 0x20a   : >> { %3364 = vmatpush1.bf16.msra.mxu1 %v3363_v19  ;;  %3334 = vmatprep.subr.bf16.mxu0 %v3333_v20  ;;  %v1704_v19 = vld [vmem:[%s5304_s16 + $0x18] sm:$0xff]  ;;  %v1703_v20 = vld [vmem:[%s5304_s16 + $0x10] sm:$0xff]  ;;  %v1734_v15 = vld [vmem:[%s5304_s16 + $0x108] sm:$0xff] }
 0x20b   : >> { %3366 = vmatprep.subr.bf16.mxu1 %v3365_v25  ;;  %v3383_v21 = vpack.c.bf16 %v1704_v19, %v1701_v18  ;;  %v3414_v25 = vpack.c.bf16 %v1706_v23, %v1703_v20  ;;  %v1733_v16 = vld [vmem:[%s5304_s16 + $0x100] sm:$0xff]  ;;  %v1738_v20 = vld [vmem:[%s5304_s16 + $0x128] sm:$0xff]  ;;  %v1740_v26 = vld [vmem:[%s5304_s16 + $0x138] sm:$0xff] }
 0x20c   : >> { %v1737_v23 = vld [vmem:[%s5304_s16 + $0x120] sm:$0xff]  ;;  %v1739_v27 = vld [vmem:[%s5304_s16 + $0x130] sm:$0xff] }
 0x20d   : >> { %3336 = vmatpush1.bf16.msra.mxu0 %v3335_v32  ;;  %v1709_v32 = vld [vmem:[%s5304_s16 + $0x40] sm:$0xff] }
 0x20e   : >> { %3368 = vmatpush1.bf16.msra.mxu1 %v3367_v37  ;;  %3338 = vmatprep.subr.bf16.mxu0 %v3337_v38  ;;  %v3387_v37 = vpack.c.bf16 %v1710_v31, %v1707_v29  ;;  %v1712_v38 = vld [vmem:[%s5304_s16 + $0x58] sm:$0xff]  ;;  %v3407_v29 = vpack.c.bf16 %v1740_v26, %v1737_v23 }
 0x20f   : >> { %3370 = vmatprep.subr.bf16.mxu1 %v3369_v42  ;;  %v3417_v39 = vpack.c.bf16 %v1712_v38, %v1709_v32  ;;  %v3389_v42 = vpack.c.bf16 %v1717_v41, %v1714_v40  ;;  %v1744_v31 = vld [vmem:[%s5304_s16 + $0x158] sm:$0xff]  ;;  %v1747_v32 = vld [vmem:[%s5304_s16 + $0x170] sm:$0xff]  ;;  %v1746_v40 = vld [vmem:[%s5304_s16 + $0x168] sm:$0xff] }
 0x210   : >> { %v3409_v38 = vpack.c.bf16 %v1747_v32, %v1744_v31  ;;  %v1745_v41 = vld [vmem:[%s5304_s16 + $0x160] sm:$0xff] }
 0x211   : >> { %3340 = vmatpush1.bf16.msra.mxu0 %v3339_v48  ;;  %v3420_v48 = vpack.c.bf16 %v1718_v47, %v1715_v45  ;;  %v4932_v45 = vshrl.u32 %v870_v33, 7  ;;  %v1890_v32 = vld [vmem:[#allocation2] sm:$0xff] }
 0x212   : >> { %3372 = vmatpush1.bf16.msra.mxu1 %v3371_v49  ;;  %3342 = vmatprep.subr.bf16.mxu0 %v3341_v50  ;;  %v1720_v49 = vld [vmem:[%s5304_s16 + $0x98] sm:$0xff]  ;;  %v1723_v50 = vld [vmem:[%s5304_s16 + $0xb0] sm:$0xff] }
 0x213   : >> { %3374 = vmatprep.subr.bf16.mxu1 %v3373_v54  ;;  %v3393_v51 = vpack.c.bf16 %v1723_v50, %v1720_v49  ;;  %v1721_v54 = vld [vmem:[%s5304_s16 + $0xa0] sm:$0xff]  ;;  %v4938_v47 = vsub.s32 1, %v4932_v45 }
 0x214   : >> { %v3423_v60 = vpack.c.bf16 %v1724_v59, %v1721_v54 }
 0x215   : >> { %3344 = vmatpush1.bf16.msra.mxu0 %v3343_v63  ;;  %v3397_v63 = vpack.c.bf16 %v1729_v62, %v1726_v61  ;;  %v1660_v49 = vrot.slane %v4215_v11, %v4938_v47 }
 0x216   : >> { %3376 = vmatpush1.bf16.msra.mxu1 %v3375_v0  ;;  %3346 = vmatprep.subr.bf16.mxu0 %v3345_v1  ;;  %v1725_v0 = vld [vmem:[%s5304_s16 + $0xc0] sm:$0xff]  ;;  %v1728_v1 = vld [vmem:[%s5304_s16 + $0xd8] sm:$0xff] }
 0x217   : >> { %3378 = vmatprep.subr.bf16.mxu1 %v3377_v4  ;;  %v3399_v3 = vpack.c.bf16 %v1728_v1, %v1725_v0  ;;  %v1730_v4 = vld [vmem:[%s5304_s16 + $0xe8] sm:$0xff] }
 0x218   : >> { %v3426_v5 = vpack.c.bf16 %v1730_v4, %v1727_v2 }
 0x219   : >> { %3348 = vmatpush1.bf16.msra.mxu0 %v3347_v7  ;;  %v1735_v7 = vld [vmem:[%s5304_s16 + $0x110] sm:$0xff] }
 0x21a   : >> { %3380 = vmatpush1.bf16.msra.mxu1 %v3379_v8  ;;  %3382 = vmatprep.subr.bf16.mxu0 %v3381_v17  ;;  %v1731_v8 = vld [vmem:[%s5304_s16 + $0xf0] sm:$0xff]  ;;  %v1736_v17 = vld [vmem:[%s5304_s16 + $0x118] sm:$0xff] }
 0x21b   : >> { %3413 = vmatprep.subr.bf16.mxu1 %v3862_v24  ;;  %v3403_v18 = vpack.c.bf16 %v1734_v15, %v1731_v8  ;;  %v3429_v19 = vpack.c.bf16 %v1736_v17, %v1733_v16 }
 0x21c   : >> { %1575 = vmatmul.mubr.f32.vlgmr.msra.gmra.mrb[0].mxu0 %v1233_v9 }
 0x21d   : >> { %1646 = vmatmul.mubr.f32.vlgmr.msra.gmra.mrb[0].mxu1 %v1233_v9  ;;  %1813 = vmatprep.mubr.f32.mxu0 %v3861_v30  ;;  %v3401_v9 = vpack.c.bf16 %v1735_v7, %v1732_v6 }
 0x21e   : >> { %3384 = vmatpush1.bf16.msra.mxu0 %v3383_v21  ;;  %3415 = vmatpush3.bf16.msra.mxu1 %v3414_v25  ;;  %v1741_v21 = vld [vmem:[%s5304_s16 + $0x140] sm:$0xff] }
 0x21f   : >> { %3416 = vmatprep.subr.bf16.mxu1 %v3862_v24  ;;  %3386 = vmatprep.subr.bf16.mxu0 %v3385_v28  ;;  %v3405_v25 = vpack.c.bf16 %v1741_v21, %v1738_v20  ;;  %v1742_v28 = vld [vmem:[%s5304_s16 + $0x148] sm:$0xff] }
 0x220   : >> { %3186 = vmatprep.mubr.msk.f32.mxu1 %vm3863_vm2, %v3861_v30 }
 0x222   : >> { %3388 = vmatpush1.bf16.msra.mxu0 %v3387_v37  ;;  %3418 = vmatpush3.bf16.msra.mxu1 %v3417_v39  ;;  %v3432_v37 = vpack.c.bf16 %v1742_v28, %v1739_v27  ;;  %v1743_v39 = vld [vmem:[%s5304_s16 + $0x150] sm:$0xff] }
 0x223   : >> { %3419 = vmatprep.subr.bf16.mxu1 %v3862_v24  ;;  %3390 = vmatprep.subr.bf16.mxu0 %v3389_v42  ;;  %v1748_v42 = vld [vmem:[%s5304_s16 + $0x178] sm:$0xff]  ;;  %v3411_v43 = vpack.c.bf16 %v1746_v40, %v1743_v39 }
 0x224   : >> { %v3435_v44 = vpack.c.bf16 %v1748_v42, %v1745_v41  ;;  %v1893_v39 = vld [vmem:[#allocation2 + $0x18] sm:$0xff] }
 0x226   : >> { %3392 = vmatpush1.bf16.msra.mxu0 %v3391_v46  ;;  %3421 = vmatpush3.bf16.msra.mxu1 %v3420_v48  ;;  %v4935_v46 = vsub.s32 0, %v4932_v45 }
 0x227   : >> { %3422 = vmatprep.subr.bf16.mxu1 %v3862_v24  ;;  %3394 = vmatprep.subr.bf16.mxu0 %v3393_v51 }
 0x228   : >> { %v1656_v48 = vrot.slane %v4215_v11, %v4935_v46 }
 0x22a   : >> { %3396 = vmatpush1.bf16.msra.mxu0 %v3395_v55  ;;  %3424 = vmatpush3.bf16.msra.mxu1 %v3423_v60  ;;  %v1663_v60 = vsub.s32 2, %v4932_v45 }
 0x22b   : >> { %3425 = vmatprep.subr.bf16.mxu1 %v3862_v24  ;;  %3398 = vmatprep.subr.bf16.mxu0 %v3397_v63 }
 0x22c   : >> { %v1664_v61 = vrot.slane %v4215_v11, %v1663_v60 }
 0x22e   : >> { %3400 = vmatpush1.bf16.msra.mxu0 %v3399_v3  ;;  %3427 = vmatpush3.bf16.msra.mxu1 %v3426_v5 }
 0x22f   : >> { %3428 = vmatprep.subr.bf16.mxu1 %v3862_v24  ;;  %3402 = vmatprep.subr.bf16.mxu0 %v3401_v9  ;;  %v3864_v9 = vmov 1966171168  }
 0x230   : >> { %v1909_v15 = vunpack.c.l.s4 %v3864_v9 }
 0x232   : >> { %3404 = vmatpush1.bf16.msra.mxu0 %v3403_v18  ;;  %3430 = vmatpush3.bf16.msra.mxu1 %v3429_v19  ;;  %v1910_v16 = vunpack.c.0.s8 %v1909_v15 }
 0x233   : >> { %3406 = vmatprep.subr.bf16.mxu0 %v3405_v25  ;;  %3431 = vmatprep.subr.bf16.mxu1 %v3862_v24 }
 0x234   : >> { %v1913_v17 = vsub.s32 %v1910_v16, %v4932_v45 }
 0x236   : >> { %3408 = vmatpush1.bf16.msra.mxu0 %v3407_v29  ;;  %3433 = vmatpush3.bf16.msra.mxu1 %v3432_v37 }
 0x237   : >> { %3410 = vmatprep.subr.bf16.mxu0 %v3409_v38  ;;  %3434 = vmatprep.subr.bf16.mxu1 %v3862_v24  ;;  %v1892_v38 = vld [vmem:[#allocation2 + $0x10] sm:$0xff] }
 0x23a   : >> { %3412 = vmatpush1.bf16.msra.mxu0 %v3411_v43  ;;  %3436 = vmatpush3.bf16.msra.mxu1 %v3435_v44 }
 0x2ef   : >> { %v1576_v50 = vpop.f32.mrb[0].mxu0 }
 0x2f0   : >> { %v1673_v51 = vadd.f32 %v1656_v48, %v1576_v50  ;;  %v1647_v24 = vpop.f32.mrb[0].mxu1  ;;  %v1578_v52 = vpop.f32.mrb[1].mxu0  ;;  %v1894_v50 = vld [vmem:[#allocation2 + $0x20] sm:$0xff] }
 0x2f1   : >> { %v1674_v53 = vadd.f32 %v1660_v49, %v1578_v52  ;;  %v4944_v54 = vpop.f32.mrb[1].mxu1  ;;  %v1675_v62 = vadd.f32 %v1664_v61, %v1647_v24  ;;  %v1898_v61 = vld [vmem:[#allocation2 + $0x40] sm:$0xff] }
 0x2f2   : >> { %v2967_v55 = vmul.f32 -1.442695, %v1673_v51  ;;  %v1895_v51 = vld [vmem:[#allocation2 + $0x28] sm:$0xff] }
 0x2f3   : >> { %v2968_v59 = vmul.f32 -1.442695, %v1674_v53 }
 0x2f4   : >> { %3603 = vpow2.f32 %v2967_v55 }
 0x2f5   : >> { %3605 = vpow2.f32 %v2968_v59 }
 0x2f6   : >> { %3607 = vtanh.f32 %v1675_v62  ;;  %v1899_v62 = vld [vmem:[#allocation2 + $0x48] sm:$0xff] }
 0x2fe   : >> { %v3604_v63 = vpop.eup %3603 }
 0x2ff   : >> { %v3606_v0 = vpop.eup %3605  ;;  %v1680_v1 = vadd.f32 1.0, %v3604_v63 }
 0x300   : >> { %v1686_v2 = vadd.f32 1.0, %v3606_v0  ;;  %v3608_v3 = vpop.eup %3607 }
 0x301   : >> { %3609 = vrcp.f32 %v1680_v1 }
 0x302   : >> { %3611 = vrcp.f32 %v1686_v2 }
 0x30b   : >> { %v3610_v4 = vpop.eup %3609 }
 0x30c   : >> { %v3612_v5 = vpop.eup %3611  ;;  %v1697_v6 = vmul.f32 %v3610_v4, %v3608_v3  ;;  %v1896_v3 = vld [vmem:[#allocation2 + $0x30] sm:$0xff]  ;;  %v1897_v4 = vld [vmem:[#allocation2 + $0x38] sm:$0xff] }
 0x30d   : >> { %v1696_v7 = vmul.f32 %v3839_v22, %v3612_v5 }
 0x30f   : >> { %v4951_v8 = vadd.f32 %v1697_v6, %v1696_v7 }
 0x311   : >> { %1814 = vmatmul.mubr.f32.vlgmr.msra.gmra.mrb[2].mxu0 %v4951_v8  ;;  %3187 = vmatmul.mubr.f32.vlgmr.msra.gmra.mrb[2].mxu1 %v4951_v8 }
 0x312   : >> { %2488 = vmatprep.mubr.f32.mxu0 %v3861_v30  ;;  %2610 = vmatprep.mubr.f32.mxu1 %v3861_v30  ;;  %v1891_v30 = vld [vmem:[#allocation2 + $0x8] sm:$0xff] }
 0x3e4   : >> { %v1815_v18 = vpop.f32.mrb[2].mxu0  ;;  %v4958_v19 = vpop.f32.mrb[2].mxu1 }
 0x3e5   : >> { %v1907_v20 = vcombine.high %v1815_v18, %v1815_v18  ;;  %v1914_v21 = vrot.slane %v1815_v18, %v1913_v17  ;;  %v4960_v23 = vpop.f32.mrb[3].mxu0  ;;  %v3188_v25 = vpop.f32.mrb[3].mxu1 }
 0x3e6   : >> { %v1901_v25 = vld [vmem:[#allocation2 + $0x58] sm:$0xff] }
 0x3e7   : >> { %v1922_v26 = vcombine.high %v1914_v21, %v1914_v21  ;;  %v1930_v27 = vrot.slane %v1914_v21, %v1913_v17  ;;  %v1921_v28 = vrot.slane %v1907_v20, %v1913_v17 }
 0x3e9   : >> { %v1944_v29 = vrot.slane %v1922_v26, %v1913_v17  ;;  %v1952_v31 = vcombine.high %v1930_v27, %v1930_v27  ;;  %v1959_v37 = vrot.slane %v1930_v27, %v4935_v46  ;;  %v1937_v41 = vrot.slane %v1921_v28, %v1913_v17 }
 0x3ea   : >> { %v1923_v24 = vcombine.high %v1921_v28, %v1921_v28 }
 0x3eb   : >> { %v1963_v40 = vrot.slane %v1944_v29, %v4935_v46  ;;  %v1996_v42 = vadd.f32 %v1959_v37, %v1890_v32  ;;  %v1997_v43 = vadd.f32 %v1959_v37, %v1891_v30  ;;  %v1967_v44 = vrot.slane %v1952_v31, %v4935_v46  ;;  %v1902_v30 = vld [vmem:[#allocation2 + $0x60] sm:$0xff] }
 0x3ec   : >> { %v1954_v52 = vcombine.high %v1944_v29, %v1944_v29  ;;  %v1975_v55 = vrot.slane %v1937_v41, %v4935_v46  ;;  %v1951_v63 = vrot.slane %v1923_v24, %v1913_v17  ;;  %v1953_v6 = vcombine.high %v1937_v41, %v1937_v41  ;;  %v1900_v17 = vld [vmem:[#allocation2 + $0x50] sm:$0xff] }
 0x3ed   : >> { %v1998_v48 = vadd.f32 %v1963_v40, %v1892_v38  ;;  %v1999_v49 = vadd.f32 %v1963_v40, %v1893_v39  ;;  %3613 = vtanh.f32 %v1996_v42  ;;  %v2000_v53 = vadd.f32 %v1967_v44, %v1894_v50  ;;  %v1903_v39 = vld [vmem:[#allocation2 + $0x68] sm:$0xff] }
 0x3ee   : >> { %v2001_v59 = vadd.f32 %v1967_v44, %v1895_v51  ;;  %v2004_v0 = vadd.f32 %v1975_v55, %v1898_v61  ;;  %v1971_v1 = vrot.slane %v1954_v52, %v4935_v46  ;;  %v2005_v2 = vadd.f32 %v1975_v55, %v1899_v62  ;;  %v1905_v51 = vld [vmem:[#allocation2 + $0x78] sm:$0xff] }
 0x3ef   : >> { %3615 = vtanh.f32 %v1998_v48  ;;  %v1979_v9 = vrot.slane %v1951_v63, %v4935_v46  ;;  %v1983_v28 = vrot.slane %v1953_v6, %v4935_v46  ;;  %v1955_v29 = vcombine.high %v1951_v63, %v1951_v63  ;;  %v1904_v48 = vld [vmem:[#allocation2 + $0x70] sm:$0xff] }
 0x3f0   : >> { %3617 = vtanh.f32 %v1997_v43  ;;  %v2002_v7 = vadd.f32 %v1971_v1, %v1896_v3  ;;  %v2003_v18 = vadd.f32 %v1971_v1, %v1897_v4 }
 0x3f1   : >> { %3619 = vtanh.f32 %v1999_v49  ;;  %v2006_v27 = vadd.f32 %v1979_v9, %v1900_v17  ;;  %v2007_v32 = vadd.f32 %v1979_v9, %v1901_v25  ;;  %v2008_v41 = vadd.f32 %v1983_v28, %v1902_v30 }
 0x3f2   : >> { %3621 = vtanh.f32 %v2000_v53  ;;  %v1987_v42 = vrot.slane %v1955_v29, %v4935_v46  ;;  %v2009_v44 = vadd.f32 %v1983_v28, %v1903_v39  ;;  %v2102_v29 = vadd.s32 4294967288, %v4324_v34 }
 0x3f3   : >> { %3623 = vtanh.f32 %v2001_v59  ;;  %v2100_v39 = vsub.s32 %v4324_v34, %v4932_v45 }
 0x3f4   : >> { %3625 = vtanh.f32 %v2004_v0  ;;  %v2010_v52 = vadd.f32 %v1987_v42, %v1904_v48  ;;  %v2011_v55 = vadd.f32 %v1987_v42, %v1905_v51  ;;  %v2105_v30 = vsub.s32 %v2102_v29, %v4932_v45 }
 0x3f5   : >> { %3627 = vtanh.f32 %v2005_v2 }
 0x3f6   : >> { %3629 = vtanh.f32 %v2002_v7 }
 0x3f7   : >> { %v3614_v5 = vpop.eup %3613  ;;  %3631 = vtanh.f32 %v2003_v18 }
 0x3f8   : >> { %v2034_v16 = vmul.f32 %v3614_v5, %v4210_v10  ;;  %3633 = vtanh.f32 %v2006_v27 }
 0x3f9   : >> { %v3616_v15 = vpop.eup %3615  ;;  %3635 = vtanh.f32 %v2007_v32 }
 0x3fa   : >> { %v3618_v20 = vpop.eup %3617  ;;  %v2036_v21 = vmul.f32 %v3616_v15, %v4210_v10  ;;  %2050 = vadd.xlane.f32.xlu0 %v2034_v16  ;;  %3637 = vtanh.f32 %v2008_v41 }
 0x3fb   : >> { %v3620_v26 = vpop.eup %3619  ;;  %v2035_v31 = vmul.f32 %v3618_v20, %v4210_v10  ;;  %3639 = vtanh.f32 %v2009_v44 }
 0x3fc   : >> { %2054 = vadd.xlane.f32.xlu1 %v2036_v21  ;;  %v3622_v37 = vpop.eup %3621  ;;  %v2037_v38 = vmul.f32 %v3620_v26, %v4210_v10  ;;  %3641 = vtanh.f32 %v2010_v52 }
 0x3fd   : >> { %v3624_v40 = vpop.eup %3623  ;;  %v2038_v43 = vmul.f32 %v3622_v37, %v4210_v10  ;;  %3643 = vtanh.f32 %v2011_v55 }
 0x3fe   : >> { %2052 = vadd.xlane.f32.xlu0 %v2035_v31  ;;  %v3626_v49 = vpop.eup %3625  ;;  %v2039_v50 = vmul.f32 %v3624_v40, %v4210_v10 }
 0x3ff   : >> { %v3628_v24 = vpop.eup %3627  ;;  %v2042_v53 = vmul.f32 %v3626_v49, %v4210_v10 }
 0x400   : >> { %2056 = vadd.xlane.f32.xlu1 %v2037_v38  ;;  %v3630_v59 = vpop.eup %3629  ;;  %v2043_v61 = vmul.f32 %v3628_v24, %v4210_v10 }
 0x401   : >> { %v3632_v62 = vpop.eup %3631  ;;  %v2040_v63 = vmul.f32 %v3630_v59, %v4210_v10 }
 0x402   : >> { %2058 = vadd.xlane.f32.xlu0 %v2038_v43  ;;  %v3634_v0 = vpop.eup %3633  ;;  %v2041_v1 = vmul.f32 %v3632_v62, %v4210_v10 }
 0x403   : >> { %v3636_v2 = vpop.eup %3635  ;;  %v2044_v3 = vmul.f32 %v3634_v0, %v4210_v10 }
 0x404   : >> { %2060 = vadd.xlane.f32.xlu1 %v2039_v50  ;;  %v3638_v4 = vpop.eup %3637  ;;  %v2045_v5 = vmul.f32 %v3636_v2, %v4210_v10 }
 0x405   : >> { %v3640_v6 = vpop.eup %3639  ;;  %v2046_v7 = vmul.f32 %v3638_v4, %v4210_v10 }
 0x406   : >> { %2066 = vadd.xlane.f32.xlu0 %v2042_v53  ;;  %v3642_v9 = vpop.eup %3641  ;;  %v2047_v15 = vmul.f32 %v3640_v6, %v4210_v10 }
 0x407   : >> { %v3644_v16 = vpop.eup %3643  ;;  %v2048_v18 = vmul.f32 %v3642_v9, %v4210_v10 }
 0x408   : >> { %2068 = vadd.xlane.f32.xlu1 %v2043_v61  ;;  %v2049_v17 = vmul.f32 %v3644_v16, %v4210_v10 }
 0x40a   : >> { %2062 = vadd.xlane.f32.xlu0 %v2040_v63 }
 0x40c   : >> { %2064 = vadd.xlane.f32.xlu1 %v2041_v1 }
 0x40e   : >> { %2070 = vadd.xlane.f32.xlu0 %v2044_v3 }
 0x410   : >> { %2072 = vadd.xlane.f32.xlu1 %v2045_v5 }
 0x412   : >> { %2074 = vadd.xlane.f32.xlu0 %v2046_v7 }
 0x414   : >> { %2076 = vadd.xlane.f32.xlu1 %v2047_v15 }
 0x416   : >> { %2078 = vadd.xlane.f32.xlu0 %v2048_v18 }
 0x418   : >> { %2080 = vadd.xlane.f32.xlu1 %v2049_v17 }
 0x487   : >> { %v2051_v20 = vpop.xlane.xlu0 %2050 }
 0x488   : >> { %v2101_v51 = vrot.slane %v2051_v20, %v2100_v39 }
 0x489   : >> { %v2055_v21 = vpop.xlane.xlu1 %2054 }
 0x48a   : >> { %v2112_v42 = vrot.slane %v2055_v21, %v2100_v39 }
 0x48b   : >> { %v2053_v25 = vpop.xlane.xlu0 %2052 }
 0x48c   : >> { %v2106_v43 = vrot.slane %v2053_v25, %v2105_v30 }
 0x48d   : >> { %v2057_v26 = vpop.xlane.xlu1 %2056 }
 0x48e   : >> { %v2116_v40 = vrot.slane %v2057_v26, %v2105_v30  ;;  %v2108_v55 = vsel %vm2107_vm3, %v2106_v43, %v2101_v51  ;;  %v1667_v51 = vsub.s32 3, %v4932_v45 }
 0x48f   : >> { %v2059_v27 = vpop.xlane.xlu0 %2058 }
 0x490   : >> { %v2121_v49 = vrot.slane %v2059_v27, %v2100_v39  ;;  %v2117_v24 = vsel %vm2107_vm3, %v2116_v40, %v2112_v42 }
 0x491   : >> { %v2061_v28 = vpop.xlane.xlu1 %2060  ;;  %v2173_v63 = vsel %vm2172_vm4, %v2117_v24, %v2108_v55  ;;  %v2257_v55 = vsub.s32 5, %v4932_v45 }
 0x492   : >> { %v2125_v41 = vrot.slane %v2061_v28, %v2105_v30 }
 0x493   : >> { %v2067_v31 = vpop.xlane.xlu0 %2066 }
 0x494   : >> { %v2126_v53 = vsel %vm2107_vm3, %v2125_v41, %v2121_v49  ;;  %v2139_v5 = vrot.slane %v2067_v31, %v2100_v39  ;;  %v3865_v41 = vmov 0  }
 0x495   : >> { %v2069_v32 = vpop.xlane.xlu1 %2068  ;;  %v2175_v2 = vsel %vm2174_vm5, %v2126_v53, %v2173_v63  ;;  %3601 = vset.pattern.permute.xlu1 %v3865_v41  ;;  %3602 = vset.pattern.permute.xlu0 %v3865_v41  ;;  %v2378_v63 = vld [vmem:[%s5305_s10 + $0x10] sm:$0xff] }
 0x496   : >> { %v2143_v0 = vrot.slane %v2069_v32, %v2105_v30 }
 0x497   : >> { %v2063_v37 = vpop.xlane.xlu0 %2062 }
 0x498   : >> { %v2130_v52 = vrot.slane %v2063_v37, %v2100_v39  ;;  %v2144_v16 = vsel %vm2107_vm3, %v2143_v0, %v2139_v5 }
 0x499   : >> { %v2065_v38 = vpop.xlane.xlu1 %2064 }
 0x49a   : >> { %v2134_v44 = vrot.slane %v2065_v38, %v2105_v30 }
 0x49b   : >> { %v2071_v48 = vpop.xlane.xlu0 %2070 }
 0x49c   : >> { %v2135_v59 = vsel %vm2107_vm3, %v2134_v44, %v2130_v52  ;;  %v2148_v3 = vrot.slane %v2071_v48, %v2100_v39  ;;  %v2246_v52 = vsub.s32 4, %v4932_v45 }
 0x49d   : >> { %v2073_v50 = vpop.xlane.xlu1 %2072  ;;  %v2177_v6 = vsel %vm2176_vm6, %v2135_v59, %v2175_v2  ;;  %v2379_v59 = vld [vmem:[%s5305_s10 + $0x18] sm:$0xff] }
 0x49e   : >> { %v2152_v61 = vrot.slane %v2073_v50, %v2105_v30  ;;  %v2179_v25 = vsel %vm2178_vm7, %v2144_v16, %v2177_v6  ;;  %v2380_v6 = vld [vmem:[%s5305_s10 + $0x20] sm:$0xff] }
 0x49f   : >> { %v2075_v62 = vpop.xlane.xlu0 %2074 }
 0x4a0   : >> { %v2157_v7 = vrot.slane %v2075_v62, %v2100_v39  ;;  %v2153_v9 = vsel %vm2107_vm3, %v2152_v61, %v2148_v3  ;;  %v2376_v62 = vld [vmem:[%s5305_s10] sm:$0xff]  ;;  %v2381_v3 = vld [vmem:[%s5305_s10 + $0x28] sm:$0xff] }
 0x4a1   : >> { %v2077_v1 = vpop.xlane.xlu1 %2076  ;;  %v2181_v26 = vsel %vm2180_vm8, %v2153_v9, %v2179_v25  ;;  %v3439_v2 = vpack.c.bf16 %v2378_v63, %v2376_v62  ;;  %v2386_v25 = vld [vmem:[%s5305_s10 + $0x50] sm:$0xff]  ;;  %v2400_v63 = vld [vmem:[%s5305_s10 + $0xc0] sm:$0xff] }
 0x4a2   : >> { %v2161_v4 = vrot.slane %v2077_v1, %v2105_v30  ;;  %v2268_v1 = vsub.s32 6, %v4932_v45 }
 0x4a3   : >> { %v2079_v15 = vpop.xlane.xlu0 %2078 }
 0x4a4   : >> { %v2162_v18 = vsel %vm2107_vm3, %v2161_v4, %v2157_v7  ;;  %v2166_v20 = vrot.slane %v2079_v15, %v2100_v39  ;;  %v2383_v4 = vld [vmem:[%s5305_s10 + $0x38] sm:$0xff]  ;;  %v2382_v7 = vld [vmem:[%s5305_s10 + $0x30] sm:$0xff]  ;;  %v2279_v15 = vsub.s32 7, %v4932_v45 }
 0x4a5   : >> { %v2081_v17 = vpop.xlane.xlu1 %2080  ;;  %v2183_v28 = vsel %vm2182_vm9, %v2162_v18, %v2181_v26  ;;  %v3441_v5 = vpack.c.bf16 %v2383_v4, %v2381_v3  ;;  %v3443_v16 = vpack.c.bf16 %v2382_v7, %v2380_v6  ;;  %v2385_v18 = vld [vmem:[%s5305_s10 + $0x48] sm:$0xff]  ;;  %v1235_v3 = vld [vmem:[%s1234_s20] sm:$0xff]  ;;  %v2406_v7 = vld [vmem:[%s5305_s10 + $0xf0] sm:$0xff] }
 0x4a6   : >> { %v2170_v21 = vrot.slane %v2081_v17, %v2105_v30  ;;  %v2387_v17 = vld [vmem:[%s5305_s10 + $0x58] sm:$0xff]  ;;  %v2404_v6 = vld [vmem:[%s5305_s10 + $0xe0] sm:$0xff] }
 0x4a8   : >> { %v2171_v27 = vsel %vm2107_vm3, %v2170_v21, %v2166_v20  ;;  %v3445_v20 = vpack.c.bf16 %v2387_v17, %v2385_v18  ;;  %v2384_v21 = vld [vmem:[%s5305_s10 + $0x40] sm:$0xff] }
 0x4a9   : >> { %v2185_v29 = vsel %vm2184_vm10, %v2171_v27, %v2183_v28  ;;  %v3447_v27 = vpack.c.bf16 %v2386_v25, %v2384_v21  ;;  %v2389_v28 = vld [vmem:[%s5305_s10 + $0x68] sm:$0xff]  ;;  %v2510_v25 = vld [vmem:[#allocation11 + $0x38] sm:$0xff] }
 0x4aa   : >> { %v2187_v31 = vsel %vm875_vm0, %v2185_v29, -1e+30  ;;  %v2391_v29 = vld [vmem:[%s5305_s10 + $0x78] sm:$0xff]  ;;  %v2503_v18 = vld [vmem:[#allocation11] sm:$0xff]  ;;  %v2508_v21 = vld [vmem:[#allocation11 + $0x28] sm:$0xff] }
 0x4ab   : >> { %v2189_v32 = vsel %vm2188_vm11, %v2187_v31, -inf }
 0x4ac   : >> { %2190 = vmax.xlane.f32.xlu0 %v2189_v32  ;;  %v2388_v32 = vld [vmem:[%s5305_s10 + $0x60] sm:$0xff] }
 0x539   : >> { %v2191_v30 = vpop.xlane.xlu0 %2190 }
 0x53a   : >> { %v2192_v37 = vsub.f32 %v2187_v31, %v2191_v30  ;;  %v3449_v31 = vpack.c.bf16 %v2391_v29, %v2389_v28  ;;  %v2390_v30 = vld [vmem:[%s5305_s10 + $0x70] sm:$0xff]  ;;  %v2507_v28 = vld [vmem:[#allocation11 + $0x20] sm:$0xff] }
 0x53b   : >> { %v2509_v29 = vld [vmem:[#allocation11 + $0x30] sm:$0xff] }
 0x53c   : >> { %v2193_v38 = vmul.f32 1.442695, %v2192_v37  ;;  %v3451_v37 = vpack.c.bf16 %v2390_v30, %v2388_v32  ;;  %v2514_v32 = vld [vmem:[#allocation11 + $0x58] sm:$0xff]  ;;  %v3475_v30 = vpack.c.bf16 %v2509_v29, %v2507_v28  ;;  %v2288_v28 = vld [vmem:[%s4190_s14] sm:$0xff]  ;;  %v2290_v29 = vld [vmem:[%s4190_s14 + $0x10] sm:$0xff] }
 0x53e   : >> { %3645 = vpow2.f32 %v2193_v38  ;;  %v2393_v38 = vld [vmem:[%s5305_s10 + $0x88] sm:$0xff] }
 0x548   : >> { %v3646_v39 = vpop.eup %3645 }
 0x549   : >> { %v2195_v40 = vsel %vm2188_vm11, %v3646_v39, 0.0 }
 0x54a   : >> { %2196 = vadd.xlane.f32.xlu1 %v2195_v40 }
 0x5d7   : >> { %v2197_v42 = vpop.xlane.xlu1 %2196 }
 0x5d8   : >> { %3647 = vrcp.f32 %v2197_v42  ;;  %v2392_v42 = vld [vmem:[%s5305_s10 + $0x80] sm:$0xff] }
 0x5e2   : >> { %v3648_v43 = vpop.eup %3647 }
 0x5e3   : >> { %v5012_v44 = vmul.f32 %v3648_v43, %v3646_v39  ;;  %v2395_v39 = vld [vmem:[%s5305_s10 + $0x98] sm:$0xff]  ;;  %v2394_v43 = vld [vmem:[%s5305_s10 + $0x90] sm:$0xff] }
 0x5e4   : >> { %v3453_v40 = vpack.c.bf16 %v2395_v39, %v2393_v38  ;;  %v2511_v38 = vld [vmem:[#allocation11 + $0x40] sm:$0xff]  ;;  %v2513_v39 = vld [vmem:[#allocation11 + $0x50] sm:$0xff] }
 0x5e5   : >> { %v2203_v48 = vrot.slane %v5012_v44, %v4935_v46  ;;  %v2214_v49 = vrot.slane %v5012_v44, %v4938_v47  ;;  %v2225_v50 = vrot.slane %v5012_v44, %v1663_v60  ;;  %v2236_v24 = vrot.slane %v5012_v44, %v1667_v51  ;;  %v2377_v60 = vld [vmem:[%s5305_s10 + $0x8] sm:$0xff] }
 0x5e6   : >> { %v2247_v53 = vrot.slane %v5012_v44, %v2246_v52  ;;  %v3437_v61 = vpack.c.bf16 %v2379_v59, %v2377_v60  ;;  %v2258_v0 = vrot.slane %v5012_v44, %v2257_v55  ;;  %v2269_v9 = vrot.slane %v5012_v44, %v2268_v1  ;;  %v2401_v55 = vld [vmem:[%s5305_s10 + $0xc8] sm:$0xff]  ;;  %v2403_v60 = vld [vmem:[%s5305_s10 + $0xd8] sm:$0xff] }
 0x5e7   : >> { %2209 = vbcast.lane.b32.xlu1 %v2203_v48, 264  ;;  %2205 = vbcast.lane.b32.xlu0 %v2203_v48, 256  ;;  %v2280_v26 = vrot.slane %v5012_v44, %v2279_v15  ;;  %v3455_v48 = vpack.c.bf16 %v2394_v43, %v2392_v42  ;;  %v2966_v59 = vld [vmem:[%s1234_s20 + $0x8] sm:$0xff]  ;;  %v3461_v62 = vpack.c.bf16 %v2403_v60, %v2401_v55  ;;  %v2518_v42 = vld [vmem:[#allocation11 + $0x78] sm:$0xff]  ;;  %s2829_s20 = scalar_lea.vmem [#allocation3], %s4773_s23 }
 0x5e8   : >> { %3438 = vmatprep.subr.bf16.mxu0 %v3437_v61  ;;  %v2405_v1 = vld [vmem:[%s5305_s10 + $0xe8] sm:$0xff]  ;;  %v3479_v43 = vpack.c.bf16 %v2513_v39, %v2511_v38 }
 0x5e9   : >> { %3440 = vmatpush1.bf16.msra.mxu0 %v3439_v2  ;;  %v2407_v2 = vld [vmem:[%s5305_s10 + $0xf8] sm:$0xff]  ;;  %v2504_v15 = vld [vmem:[#allocation11 + $0x8] sm:$0xff]  ;;  %v2519_v60 = vld [vmem:[#allocation11 + $0x80] sm:$0xff] }
 0x5ea   : >> { %3442 = vmatprep.subr.bf16.mxu0 %v3441_v5  ;;  %v3465_v5 = vpack.c.bf16 %v2407_v2, %v2405_v1  ;;  %v2523_v1 = vld [vmem:[#allocation11 + $0xa0] sm:$0xff]  ;;  %v2525_v2 = vld [vmem:[#allocation11 + $0xb0] sm:$0xff] }
 0x5eb   : >> { %2216 = vbcast.lane.b32.xlu1 %v2214_v49, 256  ;;  %2227 = vbcast.lane.b32.xlu0 %v2225_v50, 256 }
 0x5ed   : >> { %3444 = vmatpush1.bf16.msra.mxu0 %v3443_v16  ;;  %v2506_v16 = vld [vmem:[#allocation11 + $0x18] sm:$0xff] }
 0x5ee   : >> { %3446 = vmatprep.subr.bf16.mxu0 %v3445_v20  ;;  %v3469_v17 = vpack.c.bf16 %v2506_v16, %v2504_v15  ;;  %v2505_v20 = vld [vmem:[#allocation11 + $0x10] sm:$0xff] }
 0x5ef   : >> { %2220 = vbcast.lane.b32.xlu1 %v2214_v49, 264  ;;  %2238 = vbcast.lane.b32.xlu0 %v2236_v24, 256  ;;  %v2397_v49 = vld [vmem:[%s5305_s10 + $0xa8] sm:$0xff] }
 0x5f0   : >> { %3470 = vmatprep.subr.bf16.mxu1 %v3469_v17 }
 0x5f1   : >> { %3448 = vmatpush1.bf16.msra.mxu0 %v3447_v27  ;;  %v3473_v27 = vpack.c.bf16 %v2510_v25, %v2508_v21  ;;  %v2291_v21 = vld [vmem:[%s4190_s14 + $0x18] sm:$0xff] }
 0x5f2   : >> { %3450 = vmatprep.subr.bf16.mxu0 %v3449_v31  ;;  %v2512_v31 = vld [vmem:[#allocation11 + $0x48] sm:$0xff] }
 0x5f3   : >> { %2231 = vbcast.lane.b32.xlu1 %v2225_v50, 264  ;;  %2249 = vbcast.lane.b32.xlu0 %v2247_v53, 256  ;;  %v2399_v50 = vld [vmem:[%s5305_s10 + $0xb8] sm:$0xff] }
 0x5f4   : >> { %v3457_v52 = vpack.c.bf16 %v2399_v50, %v2397_v49  ;;  %v2515_v49 = vld [vmem:[#allocation11 + $0x60] sm:$0xff]  ;;  %v2517_v50 = vld [vmem:[#allocation11 + $0x70] sm:$0xff] }
 0x5f5   : >> { %3452 = vmatpush1.bf16.msra.mxu0 %v3451_v37  ;;  %v3477_v37 = vpack.c.bf16 %v2514_v32, %v2512_v31  ;;  %v2293_v31 = vld [vmem:[%s4190_s14 + $0x28] sm:$0xff]  ;;  %v2292_v32 = vld [vmem:[%s4190_s14 + $0x20] sm:$0xff] }
 0x5f6   : >> { %3454 = vmatprep.subr.bf16.mxu0 %v3453_v40  ;;  %v2516_v40 = vld [vmem:[#allocation11 + $0x68] sm:$0xff] }
 0x5f7   : >> { %2242 = vbcast.lane.b32.xlu1 %v2236_v24, 264  ;;  %2260 = vbcast.lane.b32.xlu0 %v2258_v0, 256  ;;  %v2396_v24 = vld [vmem:[%s5305_s10 + $0xa0] sm:$0xff] }
 0x5f9   : >> { %3456 = vmatpush1.bf16.msra.mxu0 %v3455_v48  ;;  %v3481_v48 = vpack.c.bf16 %v2518_v42, %v2516_v40 }
 0x5fa   : >> { %3458 = vmatprep.subr.bf16.mxu0 %v3457_v52  ;;  %v2522_v52 = vld [vmem:[#allocation11 + $0x98] sm:$0xff] }
 0x5fb   : >> { %2253 = vbcast.lane.b32.xlu1 %v2247_v53, 264  ;;  %2271 = vbcast.lane.b32.xlu0 %v2269_v9, 256  ;;  %v2398_v53 = vld [vmem:[%s5305_s10 + $0xb0] sm:$0xff] }
 0x5fc   : >> { %v3459_v61 = vpack.c.bf16 %v2398_v53, %v2396_v24  ;;  %v2520_v24 = vld [vmem:[#allocation11 + $0x88] sm:$0xff]  ;;  %v3483_v53 = vpack.c.bf16 %v2517_v50, %v2515_v49  ;;  %v2294_v49 = vld [vmem:[%s4190_s14 + $0x30] sm:$0xff]  ;;  %v2295_v50 = vld [vmem:[%s4190_s14 + $0x38] sm:$0xff] }
 0x5fd   : >> { %v3485_v55 = vpack.c.bf16 %v2522_v52, %v2520_v24 }
 0x5fe   : >> { %3460 = vmatpush1.bf16.msra.mxu0 %v3459_v61  ;;  %v2524_v61 = vld [vmem:[#allocation11 + $0xa8] sm:$0xff] }
 0x5ff   : >> { %2264 = vbcast.lane.b32.xlu1 %v2258_v0, 264  ;;  %2282 = vbcast.lane.b32.xlu0 %v2280_v26, 256  ;;  %v2402_v0 = vld [vmem:[%s5305_s10 + $0xd0] sm:$0xff] }
 0x600   : >> { %v3463_v4 = vpack.c.bf16 %v2402_v0, %v2400_v63  ;;  %3462 = vmatprep.subr.bf16.mxu0 %v3461_v62  ;;  %v2526_v62 = vld [vmem:[#allocation11 + $0xb8] sm:$0xff] }
 0x601   : >> { %v3489_v0 = vpack.c.bf16 %v2526_v62, %v2524_v61  ;;  %v2296_v61 = vld [vmem:[%s4190_s14 + $0x40] sm:$0xff] }
 0x602   : >> { %3464 = vmatpush1.bf16.msra.mxu0 %v3463_v4  ;;  %v2530_v4 = vld [vmem:[#allocation11 + $0xd8] sm:$0xff] }
 0x603   : >> { %2275 = vbcast.lane.b32.xlu1 %v2269_v9, 264  ;;  %v3467_v9 = vpack.c.bf16 %v2406_v7, %v2404_v6  ;;  %3466 = vmatprep.subr.bf16.mxu0 %v3465_v5  ;;  %v3491_v5 = vpack.c.bf16 %v2525_v2, %v2523_v1  ;;  %v2527_v7 = vld [vmem:[#allocation11 + $0xc0] sm:$0xff] }
 0x606   : >> { %3468 = vmatpush1.bf16.msra.mxu0 %v3467_v9  ;;  %v2529_v9 = vld [vmem:[#allocation11 + $0xd0] sm:$0xff] }
 0x607   : >> { %2286 = vbcast.lane.b32.xlu1 %v2280_v26, 264  ;;  %v3471_v26 = vpack.c.bf16 %v2505_v20, %v2503_v18  ;;  %v3495_v15 = vpack.c.bf16 %v2529_v9, %v2527_v7 }
 0x609   : >> { %3472 = vmatpush1.bf16.msra.mxu1 %v3471_v26 }
 0x60a   : >> { %3474 = vmatprep.subr.bf16.mxu1 %v3473_v27  ;;  %v2289_v27 = vld [vmem:[%s4190_s14 + $0x8] sm:$0xff] }
 0x60b   : >> { %2656 = vperm.xlu1 %3601, %v2966_v59   ;;  %v2521_v59 = vld [vmem:[#allocation11 + $0x90] sm:$0xff] }
 0x60c   : >> { %v3487_v63 = vpack.c.bf16 %v2521_v59, %v2519_v60 }
 0x60d   : >> { %3476 = vmatpush1.bf16.msra.mxu1 %v3475_v30 }
 0x60e   : >> { %3478 = vmatprep.subr.bf16.mxu1 %v3477_v37 }
 0x60f   : >> { %2647 = vperm.xlu1 %3601, %v1235_v3   ;;  %v2528_v3 = vld [vmem:[#allocation11 + $0xc8] sm:$0xff] }
 0x610   : >> { %v3493_v6 = vpack.c.bf16 %v2530_v4, %v2528_v3 }
 0x611   : >> { %3480 = vmatpush1.bf16.msra.mxu1 %v3479_v43 }
 0x612   : >> { %3482 = vmatprep.subr.bf16.mxu1 %v3481_v48 }
 0x615   : >> { %3484 = vmatpush1.bf16.msra.mxu1 %v3483_v53 }
 0x616   : >> { %3486 = vmatprep.subr.bf16.mxu1 %v3485_v55 }
 0x619   : >> { %3488 = vmatpush1.bf16.msra.mxu1 %v3487_v63  ;;  %v2297_v63 = vld [vmem:[%s4190_s14 + $0x48] sm:$0xff] }
 0x61a   : >> { %3490 = vmatprep.subr.bf16.mxu1 %v3489_v0 }
 0x61d   : >> { %3492 = vmatpush1.bf16.msra.mxu1 %v3491_v5 }
 0x61e   : >> { %3494 = vmatprep.subr.bf16.mxu1 %v3493_v6 }
 0x621   : >> { %3496 = vmatpush1.bf16.msra.mxu1 %v3495_v15  ;;  %v2298_v15 = vld [vmem:[%s4190_s14 + $0x50] sm:$0xff] }
 0x659   : >> { %v2210_v16 = vpop.permute.xlu1 %2209  ;;  %v2206_v18 = vpop.permute.xlu0 %2205 }
 0x65a   : >> { %v2305_v37 = vmul.f32 %v2289_v27, %v2210_v16  ;;  %v2304_v38 = vmul.f32 %v2288_v28, %v2206_v18  ;;  %v2299_v18 = vld [vmem:[%s4190_s14 + $0x58] sm:$0xff] }
 0x65c   : >> { %v2320_v52 = vadd.f32 %v2305_v37, %v2304_v38 }
 0x65d   : >> { %v2217_v17 = vpop.permute.xlu1 %2216  ;;  %v2228_v20 = vpop.permute.xlu0 %2227 }
 0x65e   : >> { %v2306_v42 = vmul.f32 %v2290_v29, %v2217_v17  ;;  %v2308_v48 = vmul.f32 %v2292_v32, %v2228_v20  ;;  %v2321_v2 = vrot.slane %v2320_v52, 4  ;;  %v2300_v29 = vld [vmem:[%s4190_s14 + $0x60] sm:$0xff]  ;;  %v2301_v32 = vld [vmem:[%s4190_s14 + $0x68] sm:$0xff] }
 0x660   : >> { %v2322_v17 = vadd.f32 %v2321_v2, %v2320_v52  ;;  %v2302_v52 = vld [vmem:[%s4190_s14 + $0x70] sm:$0xff] }
 0x661   : >> { %v2221_v25 = vpop.permute.xlu1 %2220  ;;  %v2239_v26 = vpop.permute.xlu0 %2238 }
 0x662   : >> { %v2307_v30 = vmul.f32 %v2291_v21, %v2221_v25  ;;  %v2310_v60 = vmul.f32 %v2294_v49, %v2239_v26  ;;  %v2323_v38 = vrot.slane %v2322_v17, 2 }
 0x664   : >> { %v2327_v24 = vadd.f32 %v2307_v30, %v2306_v42 }
 0x665   : >> { %v2232_v39 = vpop.permute.xlu1 %2231  ;;  %v2250_v40 = vpop.permute.xlu0 %2249 }
 0x666   : >> { %v2309_v43 = vmul.f32 %v2293_v31, %v2232_v39  ;;  %v2328_v0 = vrot.slane %v2327_v24, 4  ;;  %v2312_v5 = vmul.f32 %v2296_v61, %v2250_v40  ;;  %v2324_v61 = vadd.f32 %v2323_v38, %v2322_v17 }
 0x668   : >> { %v2334_v53 = vadd.f32 %v2309_v43, %v2308_v48  ;;  %v2329_v9 = vadd.f32 %v2328_v0, %v2327_v24 }
 0x669   : >> { %v2243_v55 = vpop.permute.xlu1 %2242  ;;  %v2261_v62 = vpop.permute.xlu0 %2260 }
 0x66a   : >> { %v2311_v59 = vmul.f32 %v2295_v50, %v2243_v55  ;;  %v2335_v3 = vrot.slane %v2334_v53, 4  ;;  %v2314_v28 = vmul.f32 %v2298_v15, %v2261_v62  ;;  %v2330_v30 = vrot.slane %v2329_v9, 2  ;;  %v2303_v55 = vld [vmem:[%s4190_s14 + $0x78] sm:$0xff] }
 0x66c   : >> { %v2341_v1 = vadd.f32 %v2311_v59, %v2310_v60  ;;  %v2336_v20 = vadd.f32 %v2335_v3, %v2334_v53  ;;  %v2331_v60 = vadd.f32 %v2330_v30, %v2329_v9 }
 0x66d   : >> { %v2254_v4 = vpop.permute.xlu1 %2253  ;;  %v2272_v21 = vpop.permute.xlu0 %2271 }
 0x66e   : >> { %v2342_v6 = vrot.slane %v2341_v1, 4  ;;  %v2313_v7 = vmul.f32 %v2297_v63, %v2254_v4  ;;  %v2337_v39 = vrot.slane %v2336_v20, 2  ;;  %v2316_v48 = vmul.f32 %v2300_v29, %v2272_v21 }
 0x670   : >> { %v2348_v16 = vadd.f32 %v2313_v7, %v2312_v5  ;;  %v2343_v26 = vadd.f32 %v2342_v6, %v2341_v1  ;;  %v2338_v62 = vadd.f32 %v2337_v39, %v2336_v20  ;;  %v2332_v7 = vrot.slane %v2331_v60, 1 }
 0x671   : >> { %v2265_v25 = vpop.permute.xlu1 %2264  ;;  %v2283_v53 = vpop.permute.xlu0 %2282 }
 0x672   : >> { %v2349_v27 = vrot.slane %v2348_v16, 4  ;;  %v2315_v31 = vmul.f32 %v2299_v18, %v2265_v25  ;;  %v2344_v43 = vrot.slane %v2343_v26, 2  ;;  %v2318_v2 = vmul.f32 %v2302_v52, %v2283_v53 }
 0x673   : >> { %v2339_v18 = vrot.slane %v2338_v62, 1  ;;  %v2325_v25 = vrot.slane %v2324_v61, 1  ;;  %v2333_v17 = vadd.f32 %v2332_v7, %v2331_v60 }
 0x674   : >> { %v2350_v37 = vadd.f32 %v2349_v27, %v2348_v16  ;;  %v2355_v40 = vadd.f32 %v2315_v31, %v2314_v28  ;;  %v2345_v1 = vadd.f32 %v2344_v43, %v2343_v26 }
 0x675   : >> { %v2276_v42 = vpop.permute.xlu1 %2275  ;;  %v2340_v26 = vadd.f32 %v2339_v18, %v2338_v62  ;;  %v2326_v30 = vadd.f32 %v2325_v25, %v2324_v61  ;;  %v2532_v62 = vld [vmem:[#allocation11 + $0xe8] sm:$0xff]  ;;  %v2543_v25 = vrot.slane %v4225_v13, %v4938_v47 }
 0x676   : >> { %v2317_v49 = vmul.f32 %v2301_v32, %v2276_v42  ;;  %v2351_v50 = vrot.slane %v2350_v37, 2  ;;  %v2356_v24 = vrot.slane %v2355_v40, 4  ;;  %v2346_v27 = vrot.slane %v2345_v1, 1 }
 0x677   : >> { %v2416_v42 = vsel %vm2172_vm4, %v2333_v17, %v2326_v30 }
 0x678   : >> { %v2362_v59 = vadd.f32 %v2317_v49, %v2316_v48  ;;  %v2357_v63 = vadd.f32 %v2356_v24, %v2355_v40  ;;  %v2352_v5 = vadd.f32 %v2351_v50, %v2350_v37  ;;  %v2347_v38 = vadd.f32 %v2346_v27, %v2345_v1  ;;  %v2531_v1 = vld [vmem:[#allocation11 + $0xe0] sm:$0xff] }
 0x679   : >> { %v2287_v0 = vpop.permute.xlu1 %2286  ;;  %v2417_v49 = vsel %vm2174_vm5, %v2340_v26, %v2416_v42 }
 0x67a   : >> { %v2363_v3 = vrot.slane %v2362_v59, 4  ;;  %v2319_v4 = vmul.f32 %v2303_v55, %v2287_v0  ;;  %v2358_v6 = vrot.slane %v2357_v63, 2  ;;  %v2353_v29 = vrot.slane %v2352_v5, 1 }
 0x67b   : >> { %v2418_v52 = vsel %vm2176_vm6, %v2347_v38, %v2417_v49 }
 0x67c   : >> { %v2364_v15 = vadd.f32 %v2363_v3, %v2362_v59  ;;  %v2369_v16 = vadd.f32 %v2319_v4, %v2318_v2  ;;  %v2359_v21 = vadd.f32 %v2358_v6, %v2357_v63  ;;  %v2354_v40 = vadd.f32 %v2353_v29, %v2352_v5  ;;  %v2534_v63 = vld [vmem:[#allocation11 + $0xf8] sm:$0xff]  ;;  %v2533_v2 = vld [vmem:[#allocation11 + $0xf0] sm:$0xff] }
 0x67d   : >> { %v3497_v0 = vpack.c.bf16 %v2534_v63, %v2532_v62  ;;  %v3499_v3 = vpack.c.bf16 %v2533_v2, %v2531_v1 }
 0x67e   : >> { %v2365_v28 = vrot.slane %v2364_v15, 2  ;;  %v2370_v9 = vrot.slane %v2369_v16, 4  ;;  %v2360_v20 = vrot.slane %v2359_v21, 1  ;;  %v2419_v53 = vsel %vm2178_vm7, %v2354_v40, %v2418_v52 }
 0x67f   : >> { %3498 = vmatprep.subr.bf16.mxu1 %v3497_v0  ;;  %v1229_v40 = vstv %s3847_s0  ;;  %s1226_s0 = sadd.s32 1, %s3847_s0  }
 0x680   : >> { %v2366_v31 = vadd.f32 %v2365_v28, %v2364_v15  ;;  %v2371_v32 = vadd.f32 %v2370_v9, %v2369_v16  ;;  %v2361_v43 = vadd.f32 %v2360_v20, %v2359_v21  ;;  %3500 = vmatpush1.bf16.msra.mxu1 %v3499_v3  ;;  %v2539_v21 = vrot.slane %v4225_v13, %v4935_v46  ;;  %p1223_p0 = scmp.ge.s32.totalorder %s1226_s0, 7  }
 0x681   : >> { %vm5171_vm2 = vcmp.lt.s32.totalorder %v1229_v40, %v4283_v56  ;;  %s5308_s1 = sld [smem:[#allocation21_spill]] (%p1223_p0) }
 0x682   : >> { %v2367_v39 = vrot.slane %v2366_v31, 1  ;;  %v2372_v37 = vrot.slane %v2371_v32, 2  ;;  %v2420_v60 = vsel %vm2180_vm8, %v2361_v43, %v2419_v53  ;;  %v2674_v43 = vsel %vm5171_vm2, 1, %v3865_v41 }
 0x684   : >> { %v2373_v48 = vadd.f32 %v2372_v37, %v2371_v32  ;;  %v2368_v50 = vadd.f32 %v2367_v39, %v2366_v31 }
 0x686   : >> { %v2374_v24 = vrot.slane %v2373_v48, 1  ;;  %v2421_v59 = vsel %vm2182_vm9, %v2368_v50, %v2420_v60  ;;  %v2973_v50 = vld [vmem:[%s2829_s20 + $0x8] sm:$0xff] }
 0x687   : > { %p5309_p13 = scmp.ne.s32.totalorder (%p1223_p0), %s5308_s1, 0 }
 0x688   : >> { %v2375_v55 = vadd.f32 %v2374_v24, %v2373_v48  ;;  %v1668_v48 = vrot.slane %v4215_v11, %v1667_v51 }
 0x68a   : >> { %v2422_v61 = vsel %vm2184_vm10, %v2375_v55, %v2421_v59  ;;  %v2657_v16 = vpop.permute.xlu1 %2656  ;;  %v1676_v24 = vadd.f32 %v1668_v48, %v4944_v54 }
 0x68b   : >> { %2489 = vmatmul.mubr.f32.vlgmr.msra.gmra.mrb[4].mxu0 %v2422_v61  ;;  %vm2658_vm14 = vcmp.eq.s32.totalorder %v4324_v34, %v2657_v16  ;;  %vm2659_vm15 = vcmp.eq.s32.totalorder %v4329_v36, %v2657_v16 }
 0x68c   : >> { %v2969_v53 = vmul.f32 -1.442695, %v1676_v24 }
 0x68e   : >> { %v2648_v18 = vpop.permute.xlu1 %2647 }
 0x68f   : >> { %vm2649_vm12 = vcmp.eq.s32.totalorder %v4285_v57, %v2648_v18 }
 0x690   : >> { %vm2650_vm13 = vmand %vm2649_vm12, %vm875_vm0 }
 0x691   : >> { %v2651_v29 = vsel %vm2650_vm13, %v5012_v44, 0.0 }
 0x692   : >> { %v2652_v17 = vsel %vm2188_vm11, %v2651_v29, 0.0 }
 0x75e   : >> { %v2490_v4 = vpop.f32.mrb[4].mxu0 }
 0x75f   : >> { %v2495_v5 = vadd.f32 %v2490_v4, %v4960_v23  ;;  %v2492_v6 = vpop.f32.mrb[5].mxu0 }
 0x760   : >> { %v2631_v7 = vadd.f32 %v2492_v6, %v4958_v19 }
 0x761   : >> { %v2502_v15 = vadd.f32 %v4220_v12, %v2495_v5 }
 0x762   : >> { %v2638_v49 = vadd.f32 %v4227_v14, %v2631_v7 }
 0x763   : >> { %2611 = vmatmul.mubr.f32.vlgmr.msra.gmra.mrb[4].mxu1 %v2502_v15 }
 0x764   : >> { %v2639_v52 = vadd.f32 %v2973_v50, %v2638_v49 }
 0x766   : >> { %v2975_v55 = vmul.f32 -1.442695, %v2639_v52 }
 0x836   : >> { %v2612_v27 = vpop.f32.mrb[4].mxu1 }
 0x837   : >> { %v2613_v28 = vadd.f32 %v2612_v27, %v2539_v21  ;;  %v2614_v9 = vpop.f32.mrb[5].mxu1 }
 0x838   : >> { %v2615_v23 = vadd.f32 %v2614_v9, %v2543_v25 }
 0x83a   : >> { %v2617_v19 = vmax.f32 %v2613_v28, %v2615_v23 }
 0x83c   : >> { %2618 = vmax.xlane.f32.xlu0 %v2617_v19 }
 0x840   : >> { %2653 = vadd.xlane.f32.xlu0 %v2652_v17 }
 0x8c9   : >> { %v2619_v46 = vpop.xlane.xlu0 %2618 }
 0x8ca   : >> { %v2620_v20 = vsub.f32 %v2613_v28, %v2619_v46  ;;  %v2621_v47 = vsub.f32 %v2615_v23, %v2619_v46 }
 0x8cc   : >> { %v2622_v31 = vmul.f32 1.442695, %v2620_v20  ;;  %v2624_v32 = vmul.f32 1.442695, %v2621_v47 }
 0x8cd   : >> { %v2654_v51 = vpop.xlane.xlu0 %2653 }
 0x8ce   : >> { %3649 = vpow2.f32 %v2622_v31 }
 0x8cf   : >> { %3651 = vpow2.f32 %v2624_v32 }
 0x8d0   : >> { %3653 = vpow2.f32 %v2969_v53 }
 0x8d1   : >> { %3655 = vpow2.f32 %v2975_v55 }
 0x8d2   : >> { %3657 = vtanh.f32 %v4951_v8 }
 0x8d8   : >> { %v3650_v26 = vpop.eup %3649 }
 0x8d9   : >> { %v3652_v30 = vpop.eup %3651  ;;  %v2660_v38 = vsel %vm2658_vm14, %v3650_v26, 0.0 }
 0x8da   : >> { %v2626_v44 = vadd.f32 %v3652_v30, %v3650_v26  ;;  %v2661_v39 = vsel %vm2659_vm15, %v3652_v30, 0.0  ;;  %v3654_v60 = vpop.eup %3653 }
 0x8db   : >> { %v2662_v37 = vadd.f32 %v2661_v39, %v2660_v38  ;;  %v3656_v59 = vpop.eup %3655  ;;  %v1693_v61 = vadd.f32 1.0, %v3654_v60 }
 0x8dc   : >> { %2627 = vadd.xlane.f32.xlu1 %v2626_v44  ;;  %v2643_v41 = vadd.f32 1.0, %v3656_v59  ;;  %v3658_v54 = vpop.eup %3657 }
 0x8dd   : >> { %2663 = vadd.xlane.f32.xlu0 %v2662_v37  ;;  %3659 = vrcp.f32 %v1693_v61 }
 0x8de   : >> { %3661 = vrcp.f32 %v2643_v41 }
 0x8e7   : >> { %v3660_v63 = vpop.eup %3659 }
 0x8e8   : >> { %v3662_v0 = vpop.eup %3661  ;;  %v1700_v2 = vmul.f32 %v3660_v63, %v3658_v54 }
 0x8e9   : >> { %v2668_v4 = vsub.f32 1.0, %v3662_v0 }
 0x8eb   : >> { %v2669_v6 = vmul.f32 %v2668_v4, %v2654_v51 }
 0x8f3   : >> { %2676 = vperm.xlu0 %3602, %v2674_v43  }
 0x969   : >> { %v2628_v45 = vpop.xlane.xlu1 %2627 }
 0x96a   : >> { %3663 = vrcp.f32 %v2628_v45  ;;  %v2664_v62 = vpop.xlane.xlu0 %2663 }
 0x972   : >> { %v2677_v1 = vpop.permute.xlu0 %2676 }
 0x973   : >> { %vm2678_vm3 = vcmp.eq.s32.totalorder %v2677_v1, 1 }
 0x974   : >> { %v3664_v3 = vpop.eup %3663  ;;  %v2679_v58 = vsel %vm2678_vm3, %v1700_v2, %v3843_v58   ;;  %v2680_v22 = vsel %vm2678_vm3, %v4951_v8, %v3839_v22  }
 0x975   : >> { %v2666_v5 = vmul.f32 %v3664_v3, %v2664_v62 }
 0x976   : > { %1225 = sbr.rel (!%p1223_p0) target bundleno = 466 (0x1d2), region = 269 }
 0x977   : >> { %v2667_v7 = vmul.f32 %v3662_v0, %v2666_v5 }
 0x979   : >> { %v2670_v15 = vadd.f32 %v2669_v6, %v2667_v7 }
 0x97b   : >> { %v2671_v16 = vsel %vm5171_vm2, %v2670_v15, 0.0 }
 0x97c   : >> { %2673 = vst.msk [vmem:[%s2672_s2] sm:$0xff] %vm1206_vm1, %v2671_v16 }
 0x97d   : > { %2687 = sbr.rel (!%p5309_p13) target bundleno = 2441 (0x989), region = 165  ;;  %s2976_s23 = sshll.u32 (%p5309_p13), %s3993_s18, 3 }
 0x97e   : > { %s5310_s26 = sld [smem:[#allocation34_spill]] (%p5309_p13) }
 0x983   : > { %v2729_v8 = vld [vmem:[%s4364_s25] sm:$0xff] (%p5309_p13)  ;;  %v2731_v18 = vld [vmem:[%s4364_s25 + $0x8] sm:$0xff] (%p5309_p13)  ;;  %v2733_v21 = vld [vmem:[%s4364_s25 + $0x10] sm:$0xff] (%p5309_p13) }
 0x984   : > { %s2689_s0 = scalar_lea.vmem %s5310_s26, %s2976_s23  ;;  %v2735_v58 = vld [vmem:[%s4364_s25 + $0x18] sm:$0xff]  ;;  %v2737_v10 = vld [vmem:[%s4364_s25 + $0x20] sm:$0xff]  ;;  %v2739_v11 = vld [vmem:[%s4364_s25 + $0x28] sm:$0xff] }
 0x985   : > { %2730 = vst [vmem:[%s2689_s0] sm:$0xff] %v2729_v8  ;;  %2732 = vst [vmem:[%s2689_s0 + $0x10] sm:$0xff] %v2731_v18  ;;  %v2741_v12 = vld [vmem:[%s4364_s25 + $0x30] sm:$0xff] }
 0x986   : > { %2734 = vst [vmem:[%s2689_s0 + $0x20] sm:$0xff] %v2733_v21  ;;  %2736 = vst [vmem:[%s2689_s0 + $0x30] sm:$0xff] %v2735_v58 }
 0x987   : > { %2738 = vst [vmem:[%s2689_s0 + $0x40] sm:$0xff] %v2737_v10  ;;  %2740 = vst [vmem:[%s2689_s0 + $0x50] sm:$0xff] %v2739_v11 }
 0x988   : > { %2742 = vst [vmem:[%s2689_s0 + $0x60] sm:$0xff] %v2741_v12 }
 0x989 PF: > { %s5311_s25 = sld [smem:[#allocation19_spill]]  ;;  %s5312_s18 = sld [smem:[#allocation18_spill]] }
 0x98a   : > { %s5313_s2 = sld [smem:[#allocation20_spill]]  ;;  %s5314_s23 = smov %s3827_s24 }
 0x98f   : > { %p36_p4 = scmp.ge.s32.totalorder %s5311_s25, 4   ;;  %s5315_s24 = smov %s5312_s18 }
 0x991   :  { %38 = sbr.rel (!%p36_p4) target bundleno = 20 (0x14), region = 280 }
 0x998   :  { %2758 = vsyncpa [#allocation6], 1 }
 0x999   :  { %2760 = vsyncpa [#allocation6 + $0x1], 1 }
 0x99a   :  { %2761 = vsyncpa [#allocation8], 1 }
 0x99b   :  { %2763 = vsyncpa [#allocation8 + $0x1], 1 }
 0x99c   :  { %2764 = vsyncpa [#allocation12], 1 }

</bundles_post_ra>
